<compile_context>
chip_gen: v7x
topology: tpu7x:2x2x1
jax: 0.10.0
libtpu: 0.0.40
codegen_flags: <defaults>
</compile_context>

<pallas_src>
import jax
import jax.numpy as jnp
from jax.experimental import pallas as pl
from jax.experimental.pallas import tpu as pltpu


OUT_W = 128          # lane-dense packed output slab width
BATCH_TILE = 8       # per-grid-step batch tile; must be a multiple of 8 (f32 sublanes)


# ----------------------------- fused Pallas kernel ---------------------------

def _fused_kernel(p_ref,
                  w1_ref, b1_ref, w2_ref, b2_ref, w3_ref, b3_ref,
                  wl1_ref, bl1_ref, wl2_ref, bl2_ref, wl3_ref, bl3_ref,
                  wf1_ref, bf1_ref, wf2_ref, bf2_ref, wf3_ref, bf3_ref,
                  out_ref):
    f32, bf16 = jnp.float32, jnp.bfloat16
    bt = out_ref.shape[0]                       # batch tile (multiple of 8)

    def dense(x, w_ref, b_ref, relu):
        # bf16 MXU matmul with f32 accumulation; bias / ReLU epilogue in f32.
        y = jnp.dot(x.astype(bf16), w_ref[...], preferred_element_type=f32)
        y = y + b_ref[...]
        return jnp.maximum(y, 0.0) if relu else y

    def maxpool2x2(x):
        # x: (hin, win, bt, C) f32 -> (hin//2, win//2, bt, C).  Pure VPU:
        # leading-dim splits + elementwise max, zero MXU work.
        hin, win, _, c = x.shape
        ho, wo = hin // 2, win // 2
        x = x[:2 * ho, :2 * wo]                            # crop (floor mode)
        a = x.reshape(ho, 2, 2 * wo, bt, c)
        x = jnp.maximum(a[:, 0], a[:, 1])                  # pool rows
        b = x.reshape(ho, wo, 2, bt, c)
        return jnp.maximum(b[:, :, 0], b[:, :, 1])         # pool cols

    def conv2x2(x, w_ref, b_ref):
        # x: (hin, win, bt, C).  2x2 valid conv: lane-concat the 4 shifted tap
        # slabs (K = 4*C) and run ONE MXU matmul against the tap-stacked,
        # block-diagonal weight.  Tap order (dh, dw) matches pack_model.
        hin, win, _, c = x.shape
        ho, wo = hin - 1, win - 1
        taps = jnp.concatenate(
            [x[0:ho, 0:wo], x[0:ho, 1:win], x[1:hin, 0:wo], x[1:hin, 1:win]],
            axis=-1)                                       # (ho, wo, bt, 4C)
        y = dense(taps.reshape(ho * wo * bt, 4 * c), w_ref, b_ref, relu=True)
        return y.reshape(ho, wo, bt, w_ref.shape[-1])

    # conv1 (3x3) on both digits, branches channel-stacked [branch1 | branch2].
    y1 = dense(p_ref[...], w1_ref, b1_ref, relu=True)      # (bt*144, 64)
    y1 = y1.reshape(12, 12, bt, 64)                        # rows ordered (i, j, b)

    q1 = maxpool2x2(y1)                                    # (6, 6, bt, 64)
    y2 = conv2x2(q1, w2_ref, b2_ref)                       # (5, 5, bt, 128)
    q2 = maxpool2x2(y2)                                    # (2, 2, bt, 128)
    y3 = conv2x2(q2, w3_ref, b3_ref)                       # (1, 1, bt, 256)
    feat = y3.reshape(bt, 256)                             # [branch1 128 | branch2 128]

    # classifier1 / classifier2 (block-diagonal, eval-mode BN folded, Dropout = id).
    h = dense(feat, wl1_ref, bl1_ref, relu=True)           # (bt, 150)
    h = dense(h, wl2_ref, bl2_ref, relu=True)              # (bt, 150)
    aux = dense(h, wl3_ref, bl3_ref, relu=False)           # (bt, 128): cols 2:12 aux1, 12:22 aux2

    # classifierf on cat(aux2, aux1): permutation + slab placement folded into wf1/wf3.
    g = dense(aux, wf1_ref, bf1_ref, relu=True)            # (bt, 50)
    g = dense(g, wf2_ref, bf2_ref, relu=True)              # (bt, 10)
    out = dense(g, wf3_ref, bf3_ref, relu=False)           # (bt, 128): cols 0:2 logits

    # Single lane-dense 128-wide output store (logits + both aux heads).
    out_ref[...] = out + aux


def _bcast_spec(shape):
    zeros = (0,) * len(shape)
    return pl.BlockSpec(shape, lambda g, _z=zeros: _z)


# ------------------------------ wrapper (JAX) --------------------------------

def _conv1_patches(x, bt):
    # x: (B, 2, 14, 14) NCHW -> conv1 im2col patches (Bp*144, 18) bf16 with
    # rows ordered (batch_tile, i, j, b_local) to match the kernel's layout.
    B = x.shape[0]
    Bp = ((B + bt - 1) // bt) * bt
    if Bp != B:
        x = jnp.pad(x, ((0, Bp - B), (0, 0), (0, 0), (0, 0)))

    def im2col(img):  # (Bp, 14, 14) -> (Bp, 12, 12, 9), feature order (dh, dw)
        cols = [img[:, dh:dh + 12, dw:dw + 12] for dh in range(3) for dw in range(3)]
        return jnp.stack(cols, axis=-1)

    p = jnp.concatenate([im2col(x[:, 0]), im2col(x[:, 1])], axis=-1)   # (Bp, 12, 12, 18)
    p = p.reshape(Bp // bt, bt, 12, 12, 18)
    p = jnp.transpose(p, (0, 2, 3, 1, 4))                               # (G, 12, 12, bt, 18)
    return p.reshape(Bp * 144, 18).astype(jnp.bfloat16), Bp


def non_siamese_forward(model, x, bt=BATCH_TILE):
    """x: (B, 2, 14, 14) float32 (NCHW as in the PyTorch module)."""
    assert bt % 8 == 0
    B = x.shape[0]
    p1, Bp = _conv1_patches(x, bt)
    grid = (Bp // bt,)

    args = (p1,
            model['w1'], model['b1'], model['w2'], model['b2'], model['w3'], model['b3'],
            model['wl1'], model['bl1'], model['wl2'], model['bl2'], model['wl3'], model['bl3'],
            model['wf1'], model['bf1'], model['wf2'], model['bf2'], model['wf3'], model['bf3'])

    # Per-step footprint is O(bt) and well under every generation's scoped
    # VMEM default (incl. v7x's 32 MiB); weights use constant block indices so
    # they are fetched once; the patch block is double-buffered across steps.
    slab = pl.pallas_call(
        _fused_kernel,
        out_shape=jax.ShapeDtypeStruct((Bp, OUT_W), jnp.float32),
        grid=grid,
        in_specs=[pl.BlockSpec((bt * 144, 18), lambda g: (g, 0))] +
                 [_bcast_spec(a.shape) for a in args[1:]],
        out_specs=pl.BlockSpec((bt, OUT_W), lambda g: (g, 0)),
        compiler_params=pltpu.CompilerParams(dimension_semantics=("parallel",)),
    )(*args)

    out = slab[:B, 0:2]
    aux1 = slab[:B, 2:12]
    aux2 = slab[:B, 12:22]
    return out, [aux1, aux2]


# --------------------------- parameter init / packing ------------------------

def _uniform(key, shape, bound):
    return jax.random.uniform(key, shape, jnp.float32, -bound, bound)


def init_raw_params(key, chan1=32, chan2=64, chan3=128,
                    nb_hidden1=75, nb_hidden2=75, nb_hidden3=50, nb_hidden4=10):
    keys = iter(jax.random.split(key, 64))

    def conv(cin, cout, k):
        bound = 1.0 / (cin * k * k) ** 0.5
        return {'w': _uniform(next(keys), (cout, cin, k, k), bound),
                'b': _uniform(next(keys), (cout,), bound)}

    def linear(fin, fout):
        bound = 1.0 / fin ** 0.5
        return {'w': _uniform(next(keys), (fout, fin), bound),
                'b': _uniform(next(keys), (fout,), bound)}

    def bn(n, eps=1e-5):
        # torch eval defaults: gamma=1, beta=0, running_mean=0, running_var=1
        return {'gamma': jnp.ones((n,), jnp.float32), 'beta': jnp.zeros((n,), jnp.float32),
                'mean': jnp.zeros((n,), jnp.float32), 'var': jnp.ones((n,), jnp.float32),
                'eps': eps}

    def features():
        return [conv(1, chan1, 3), conv(chan1, chan2, 2), conv(chan2, chan3, 2)]

    def classifier(fin, h1, h2, fout):
        return {'l1': linear(fin, h1), 'bn1': bn(h1),
                'l2': linear(h1, h2), 'bn2': bn(h2),
                'l3': linear(h2, fout)}

    linear_size = chan3 * 1 * 1   # features output on a 14x14 input: (chan3, 1, 1)
    return {'features1': features(), 'features2': features(),
            'classifier1': classifier(linear_size, nb_hidden1, nb_hidden2, 10),
            'classifier2': classifier(linear_size, nb_hidden1, nb_hidden2, 10),
            'classifierf': classifier(20, nb_hidden3, nb_hidden4, 2)}


def _fold_bn(lin, bnp):
    # Fold eval-mode BatchNorm1d into the preceding Linear; weight -> (in, out).
    scale = bnp['gamma'] / jnp.sqrt(bnp['var'] + bnp['eps'])
    w = lin['w'].T * scale[None, :]
    b = (lin['b'] - bnp['mean']) * scale + bnp['beta']
    return w, b


def _blockdiag(wa, wb):
    i, o = wa.shape
    w = jnp.zeros((2 * i, 2 * o), jnp.float32)
    return w.at[:i, :o].set(wa).at[i:, o:].set(wb)


def pack_model(raw):
    c1a, c2a, c3a = raw['features1']
    c1b, c2b, c3b = raw['features2']

    def conv1_weight(c):
        # (cout, 1, 3, 3) -> (9, cout), patch order (dh, dw) matching im2col.
        return jnp.transpose(c['w'], (2, 3, 1, 0)).reshape(9, -1)

    def conv_cat_weight(ca, cb):
        # Tap-stacked (along K) block-diagonal weight: (k*k*2*cin, 2*cout) bf16.
        k = ca['w'].shape[-1]
        taps = [_blockdiag(ca['w'][:, :, dh, dw].T, cb['w'][:, :, dh, dw].T)
                for dh in range(k) for dw in range(k)]
        return jnp.concatenate(taps, axis=0).astype(jnp.bfloat16)

    def row(b):
        return b[None, :]

    model = {
        'w1': _blockdiag(conv1_weight(c1a), conv1_weight(c1b)).astype(jnp.bfloat16),  # (18, 64)
        'b1': row(jnp.concatenate([c1a['b'], c1b['b']])),
        'w2': conv_cat_weight(c2a, c2b),                        # (256, 128)
        'b2': row(jnp.concatenate([c2a['b'], c2b['b']])),
        'w3': conv_cat_weight(c3a, c3b),                        # (512, 256)
        'b3': row(jnp.concatenate([c3a['b'], c3b['b']])),
    }

    ca, cb = raw['classifier1'], raw['classifier2']
    w1a, b1a = _fold_bn(ca['l1'], ca['bn1']); w1b, b1b = _fold_bn(cb['l1'], cb['bn1'])
    w2a, b2a = _fold_bn(ca['l2'], ca['bn2']); w2b, b2b = _fold_bn(cb['l2'], cb['bn2'])
    model['wl1'] = _blockdiag(w1a, w1b).astype(jnp.bfloat16)    # (256, 150)
    model['bl1'] = row(jnp.concatenate([b1a, b1b]))
    model['wl2'] = _blockdiag(w2a, w2b).astype(jnp.bfloat16)    # (150, 150)
    model['bl2'] = row(jnp.concatenate([b2a, b2b]))

    # Per-digit heads padded into the packed 128-lane output slab:
    # cols 0:2 reserved for the final logits, 2:12 = aux1, 12:22 = aux2.
    wl3 = _blockdiag(ca['l3']['w'].T, cb['l3']['w'].T)          # (150, 20)
    bl3 = jnp.concatenate([ca['l3']['b'], cb['l3']['b']])
    model['wl3'] = jnp.zeros((150, OUT_W), jnp.float32).at[:, 2:22].set(wl3).astype(jnp.bfloat16)
    model['bl3'] = row(jnp.zeros((OUT_W,), jnp.float32).at[2:22].set(bl3))

    cf = raw['classifierf']
    wf1, bf1 = _fold_bn(cf['l1'], cf['bn1'])                    # (20, 50)
    # forward uses diff = cat(aux2, aux1); the aux slab holds [aux1 | aux2] at
    # cols 2:22, so fold the permutation AND the slab placement into wf1.
    wf1 = jnp.concatenate([wf1[10:20], wf1[0:10]], axis=0)
    model['wf1'] = jnp.zeros((OUT_W, 50), jnp.float32).at[2:22, :].set(wf1).astype(jnp.bfloat16)
    model['bf1'] = row(bf1)
    wf2, bf2 = _fold_bn(cf['l2'], cf['bn2'])                    # (50, 10)
    model['wf2'] = wf2.astype(jnp.bfloat16)
    model['bf2'] = row(bf2)
    model['wf3'] = jnp.zeros((10, OUT_W), jnp.float32).at[:, 0:2].set(cf['l3']['w'].T).astype(jnp.bfloat16)
    model['bf3'] = row(jnp.zeros((OUT_W,), jnp.float32).at[0:2].set(cf['l3']['b']))
    return model


# ---------------------------------- main --------------------------------------

if __name__ == "__main__":
    key = jax.random.PRNGKey(0)
    pkey, xkey = jax.random.split(key)

    model = pack_model(init_raw_params(pkey))
    B = 2
    x = jax.random.normal(xkey, (B, 2, 14, 14), jnp.float32)

    fwd = jax.jit(lambda xx: non_siamese_forward(model, xx))
    out, aux = fwd(x)
    jax.block_until_ready(out)
    jax.block_until_ready(aux[0])
    jax.block_until_ready(aux[1])

    assert out.shape == (B, 2)
    assert aux[0].shape == (B, 10) and aux[1].shape == (B, 10)
    print("KERNEL_OK")
</pallas_src>

<mosaic_0001>
module attributes {stable_mosaic.version = 11 : i64} {
  func.func @_fused_kernel(%arg0: i32, %arg1: memref<1152x18xbf16, #tpu.memory_space<vmem>>, %arg2: memref<18x64xbf16, #tpu.memory_space<vmem>>, %arg3: memref<1x64xf32, #tpu.memory_space<vmem>>, %arg4: memref<256x128xbf16, #tpu.memory_space<vmem>>, %arg5: memref<1x128xf32, #tpu.memory_space<vmem>>, %arg6: memref<512x256xbf16, #tpu.memory_space<vmem>>, %arg7: memref<1x256xf32, #tpu.memory_space<vmem>>, %arg8: memref<256x150xbf16, #tpu.memory_space<vmem>>, %arg9: memref<1x150xf32, #tpu.memory_space<vmem>>, %arg10: memref<150x150xbf16, #tpu.memory_space<vmem>>, %arg11: memref<1x150xf32, #tpu.memory_space<vmem>>, %arg12: memref<150x128xbf16, #tpu.memory_space<vmem>>, %arg13: memref<1x128xf32, #tpu.memory_space<vmem>>, %arg14: memref<128x50xbf16, #tpu.memory_space<vmem>>, %arg15: memref<1x50xf32, #tpu.memory_space<vmem>>, %arg16: memref<50x10xbf16, #tpu.memory_space<vmem>>, %arg17: memref<1x10xf32, #tpu.memory_space<vmem>>, %arg18: memref<10x128xbf16, #tpu.memory_space<vmem>>, %arg19: memref<1x128xf32, #tpu.memory_space<vmem>>, %arg20: memref<8x128xf32, #tpu.memory_space<vmem>>) attributes {dimension_semantics = [#tpu.dimension_semantics<parallel>], iteration_bounds = array<i64: 1>, scalar_prefetch = 0 : i64, scratch_operands = 0 : i64, tpu.core_type = #tpu.core_type<tc>, window_params = [{transform_indices = @transform_0, window_bounds = array<i64: 1152, 18>}, {pipeline_mode = #tpu.pipeline_mode<synchronous>, transform_indices = @transform_1, window_bounds = array<i64: 18, 64>}, {pipeline_mode = #tpu.pipeline_mode<synchronous>, transform_indices = @transform_2, window_bounds = array<i64: 1, 64>}, {pipeline_mode = #tpu.pipeline_mode<synchronous>, transform_indices = @transform_3, window_bounds = array<i64: 256, 128>}, {pipeline_mode = #tpu.pipeline_mode<synchronous>, transform_indices = @transform_4, window_bounds = array<i64: 1, 128>}, {pipeline_mode = #tpu.pipeline_mode<synchronous>, transform_indices = @transform_5, window_bounds = array<i64: 512, 256>}, {pipeline_mode = #tpu.pipeline_mode<synchronous>, transform_indices = @transform_6, window_bounds = array<i64: 1, 256>}, {pipeline_mode = #tpu.pipeline_mode<synchronous>, transform_indices = @transform_7, window_bounds = array<i64: 256, 150>}, {pipeline_mode = #tpu.pipeline_mode<synchronous>, transform_indices = @transform_8, window_bounds = array<i64: 1, 150>}, {pipeline_mode = #tpu.pipeline_mode<synchronous>, transform_indices = @transform_9, window_bounds = array<i64: 150, 150>}, {pipeline_mode = #tpu.pipeline_mode<synchronous>, transform_indices = @transform_10, window_bounds = array<i64: 1, 150>}, {pipeline_mode = #tpu.pipeline_mode<synchronous>, transform_indices = @transform_11, window_bounds = array<i64: 150, 128>}, {pipeline_mode = #tpu.pipeline_mode<synchronous>, transform_indices = @transform_12, window_bounds = array<i64: 1, 128>}, {pipeline_mode = #tpu.pipeline_mode<synchronous>, transform_indices = @transform_13, window_bounds = array<i64: 128, 50>}, {pipeline_mode = #tpu.pipeline_mode<synchronous>, transform_indices = @transform_14, window_bounds = array<i64: 1, 50>}, {pipeline_mode = #tpu.pipeline_mode<synchronous>, transform_indices = @transform_15, window_bounds = array<i64: 50, 10>}, {pipeline_mode = #tpu.pipeline_mode<synchronous>, transform_indices = @transform_16, window_bounds = array<i64: 1, 10>}, {pipeline_mode = #tpu.pipeline_mode<synchronous>, transform_indices = @transform_17, window_bounds = array<i64: 10, 128>}, {pipeline_mode = #tpu.pipeline_mode<synchronous>, transform_indices = @transform_18, window_bounds = array<i64: 1, 128>}, {transform_indices = @transform_19, window_bounds = array<i64: 8, 128>}]} {
    %c0 = arith.constant 0 : index
    %c0_0 = arith.constant 0 : index
    %0 = vector.load %arg1[%c0, %c0_0] : memref<1152x18xbf16, #tpu.memory_space<vmem>>, vector<1152x18xbf16>
    %c0_1 = arith.constant 0 : index
    %c0_2 = arith.constant 0 : index
    %1 = vector.load %arg2[%c0_1, %c0_2] : memref<18x64xbf16, #tpu.memory_space<vmem>>, vector<18x64xbf16>
    %cst = arith.constant dense<0.000000e+00> : vector<1152x64xf32>
    %2 = tpu.matmul %0, %1, %cst {dimension_numbers = #tpu.dot_dimension_numbers<[1], [0], [0], [1], [0, 0, 1, 1], [], []>} : vector<1152x18xbf16>, vector<18x64xbf16>, vector<1152x64xf32> -> vector<1152x64xf32>
    %c0_3 = arith.constant 0 : index
    %c0_4 = arith.constant 0 : index
    %3 = vector.load %arg3[%c0_3, %c0_4] : memref<1x64xf32, #tpu.memory_space<vmem>>, vector<1x64xf32>
    %4 = vector.broadcast %3 : vector<1x64xf32> to vector<1152x64xf32>
    %5 = arith.addf %2, %4 : vector<1152x64xf32>
    %cst_5 = arith.constant 0.000000e+00 : f32
    %6 = vector.broadcast %cst_5 : f32 to vector<1152x64xf32>
    %7 = arith.maximumf %5, %6 : vector<1152x64xf32>
    %8 = vector.shape_cast %7 : vector<1152x64xf32> to vector<12x12x8x64xf32>
    %9 = vector.shape_cast %8 : vector<12x12x8x64xf32> to vector<6x2x12x8x64xf32>
    %10 = vector.extract_strided_slice %9 {offsets = [0, 0, 0, 0, 0], sizes = [6, 1, 12, 8, 64], strides = [1, 1, 1, 1, 1]} : vector<6x2x12x8x64xf32> to vector<6x1x12x8x64xf32>
    %11 = vector.shape_cast %10 : vector<6x1x12x8x64xf32> to vector<6x12x8x64xf32>
    %12 = vector.extract_strided_slice %9 {offsets = [0, 1, 0, 0, 0], sizes = [6, 1, 12, 8, 64], strides = [1, 1, 1, 1, 1]} : vector<6x2x12x8x64xf32> to vector<6x1x12x8x64xf32>
    %13 = vector.shape_cast %12 : vector<6x1x12x8x64xf32> to vector<6x12x8x64xf32>
    %14 = arith.maximumf %11, %13 : vector<6x12x8x64xf32>
    %15 = vector.shape_cast %14 : vector<6x12x8x64xf32> to vector<6x6x2x8x64xf32>
    %16 = vector.extract_strided_slice %15 {offsets = [0, 0, 0, 0, 0], sizes = [6, 6, 1, 8, 64], strides = [1, 1, 1, 1, 1]} : vector<6x6x2x8x64xf32> to vector<6x6x1x8x64xf32>
    %17 = vector.shape_cast %16 : vector<6x6x1x8x64xf32> to vector<6x6x8x64xf32>
    %18 = vector.extract_strided_slice %15 {offsets = [0, 0, 1, 0, 0], sizes = [6, 6, 1, 8, 64], strides = [1, 1, 1, 1, 1]} : vector<6x6x2x8x64xf32> to vector<6x6x1x8x64xf32>
    %19 = vector.shape_cast %18 : vector<6x6x1x8x64xf32> to vector<6x6x8x64xf32>
    %20 = arith.maximumf %17, %19 : vector<6x6x8x64xf32>
    %21 = vector.extract_strided_slice %20 {offsets = [0, 0, 0, 0], sizes = [5, 5, 8, 64], strides = [1, 1, 1, 1]} : vector<6x6x8x64xf32> to vector<5x5x8x64xf32>
    %22 = vector.extract_strided_slice %20 {offsets = [0, 1, 0, 0], sizes = [5, 5, 8, 64], strides = [1, 1, 1, 1]} : vector<6x6x8x64xf32> to vector<5x5x8x64xf32>
    %23 = vector.extract_strided_slice %20 {offsets = [1, 0, 0, 0], sizes = [5, 5, 8, 64], strides = [1, 1, 1, 1]} : vector<6x6x8x64xf32> to vector<5x5x8x64xf32>
    %24 = vector.extract_strided_slice %20 {offsets = [1, 1, 0, 0], sizes = [5, 5, 8, 64], strides = [1, 1, 1, 1]} : vector<6x6x8x64xf32> to vector<5x5x8x64xf32>
    %25 = tpu.concatenate %21, %22, %23, %24 in 3 : vector<5x5x8x64xf32>, vector<5x5x8x64xf32>, vector<5x5x8x64xf32>, vector<5x5x8x64xf32> -> vector<5x5x8x256xf32>
    %26 = vector.shape_cast %25 : vector<5x5x8x256xf32> to vector<200x256xf32>
    %27 = arith.truncf %26 : vector<200x256xf32> to vector<200x256xbf16>
    %c0_6 = arith.constant 0 : index
    %c0_7 = arith.constant 0 : index
    %28 = vector.load %arg4[%c0_6, %c0_7] : memref<256x128xbf16, #tpu.memory_space<vmem>>, vector<256x128xbf16>
    %cst_8 = arith.constant dense<0.000000e+00> : vector<200x128xf32>
    %29 = tpu.matmul %27, %28, %cst_8 {dimension_numbers = #tpu.dot_dimension_numbers<[1], [0], [0], [1], [0, 0, 1, 1], [], []>} : vector<200x256xbf16>, vector<256x128xbf16>, vector<200x128xf32> -> vector<200x128xf32>
    %c0_9 = arith.constant 0 : index
    %c0_10 = arith.constant 0 : index
    %30 = vector.load %arg5[%c0_9, %c0_10] : memref<1x128xf32, #tpu.memory_space<vmem>>, vector<1x128xf32>
    %31 = vector.broadcast %30 : vector<1x128xf32> to vector<200x128xf32>
    %32 = arith.addf %29, %31 : vector<200x128xf32>
    %cst_11 = arith.constant 0.000000e+00 : f32
    %33 = vector.broadcast %cst_11 : f32 to vector<200x128xf32>
    %34 = arith.maximumf %32, %33 : vector<200x128xf32>
    %35 = vector.shape_cast %34 : vector<200x128xf32> to vector<5x5x8x128xf32>
    %36 = vector.extract_strided_slice %35 {offsets = [0, 0, 0, 0], sizes = [4, 4, 8, 128], strides = [1, 1, 1, 1]} : vector<5x5x8x128xf32> to vector<4x4x8x128xf32>
    %37 = vector.shape_cast %36 : vector<4x4x8x128xf32> to vector<2x2x4x8x128xf32>
    %38 = vector.extract_strided_slice %37 {offsets = [0, 0, 0, 0, 0], sizes = [2, 1, 4, 8, 128], strides = [1, 1, 1, 1, 1]} : vector<2x2x4x8x128xf32> to vector<2x1x4x8x128xf32>
    %39 = vector.shape_cast %38 : vector<2x1x4x8x128xf32> to vector<2x4x8x128xf32>
    %40 = vector.extract_strided_slice %37 {offsets = [0, 1, 0, 0, 0], sizes = [2, 1, 4, 8, 128], strides = [1, 1, 1, 1, 1]} : vector<2x2x4x8x128xf32> to vector<2x1x4x8x128xf32>
    %41 = vector.shape_cast %40 : vector<2x1x4x8x128xf32> to vector<2x4x8x128xf32>
    %42 = arith.maximumf %39, %41 : vector<2x4x8x128xf32>
    %43 = vector.shape_cast %42 : vector<2x4x8x128xf32> to vector<2x2x2x8x128xf32>
    %44 = vector.extract_strided_slice %43 {offsets = [0, 0, 0, 0, 0], sizes = [2, 2, 1, 8, 128], strides = [1, 1, 1, 1, 1]} : vector<2x2x2x8x128xf32> to vector<2x2x1x8x128xf32>
    %45 = vector.shape_cast %44 : vector<2x2x1x8x128xf32> to vector<2x2x8x128xf32>
    %46 = vector.extract_strided_slice %43 {offsets = [0, 0, 1, 0, 0], sizes = [2, 2, 1, 8, 128], strides = [1, 1, 1, 1, 1]} : vector<2x2x2x8x128xf32> to vector<2x2x1x8x128xf32>
    %47 = vector.shape_cast %46 : vector<2x2x1x8x128xf32> to vector<2x2x8x128xf32>
    %48 = arith.maximumf %45, %47 : vector<2x2x8x128xf32>
    %49 = vector.extract_strided_slice %48 {offsets = [0, 0, 0, 0], sizes = [1, 1, 8, 128], strides = [1, 1, 1, 1]} : vector<2x2x8x128xf32> to vector<1x1x8x128xf32>
    %50 = vector.extract_strided_slice %48 {offsets = [0, 1, 0, 0], sizes = [1, 1, 8, 128], strides = [1, 1, 1, 1]} : vector<2x2x8x128xf32> to vector<1x1x8x128xf32>
    %51 = vector.extract_strided_slice %48 {offsets = [1, 0, 0, 0], sizes = [1, 1, 8, 128], strides = [1, 1, 1, 1]} : vector<2x2x8x128xf32> to vector<1x1x8x128xf32>
    %52 = vector.extract_strided_slice %48 {offsets = [1, 1, 0, 0], sizes = [1, 1, 8, 128], strides = [1, 1, 1, 1]} : vector<2x2x8x128xf32> to vector<1x1x8x128xf32>
    %53 = tpu.concatenate %49, %50, %51, %52 in 3 : vector<1x1x8x128xf32>, vector<1x1x8x128xf32>, vector<1x1x8x128xf32>, vector<1x1x8x128xf32> -> vector<1x1x8x512xf32>
    %54 = vector.shape_cast %53 : vector<1x1x8x512xf32> to vector<8x512xf32>
    %55 = arith.truncf %54 : vector<8x512xf32> to vector<8x512xbf16>
    %c0_12 = arith.constant 0 : index
    %c0_13 = arith.constant 0 : index
    %56 = vector.load %arg6[%c0_12, %c0_13] : memref<512x256xbf16, #tpu.memory_space<vmem>>, vector<512x256xbf16>
    %cst_14 = arith.constant dense<0.000000e+00> : vector<8x256xf32>
    %57 = tpu.matmul %55, %56, %cst_14 {dimension_numbers = #tpu.dot_dimension_numbers<[1], [0], [0], [1], [0, 0, 1, 1], [], []>} : vector<8x512xbf16>, vector<512x256xbf16>, vector<8x256xf32> -> vector<8x256xf32>
    %c0_15 = arith.constant 0 : index
    %c0_16 = arith.constant 0 : index
    %58 = vector.load %arg7[%c0_15, %c0_16] : memref<1x256xf32, #tpu.memory_space<vmem>>, vector<1x256xf32>
    %59 = vector.broadcast %58 : vector<1x256xf32> to vector<8x256xf32>
    %60 = arith.addf %57, %59 : vector<8x256xf32>
    %cst_17 = arith.constant 0.000000e+00 : f32
    %61 = vector.broadcast %cst_17 : f32 to vector<8x256xf32>
    %62 = arith.maximumf %60, %61 : vector<8x256xf32>
    %63 = vector.shape_cast %62 : vector<8x256xf32> to vector<1x1x8x256xf32>
    %64 = vector.shape_cast %63 : vector<1x1x8x256xf32> to vector<8x256xf32>
    %65 = arith.truncf %64 : vector<8x256xf32> to vector<8x256xbf16>
    %c0_18 = arith.constant 0 : index
    %c0_19 = arith.constant 0 : index
    %66 = vector.load %arg8[%c0_18, %c0_19] : memref<256x150xbf16, #tpu.memory_space<vmem>>, vector<256x150xbf16>
    %cst_20 = arith.constant dense<0.000000e+00> : vector<8x150xf32>
    %67 = tpu.matmul %65, %66, %cst_20 {dimension_numbers = #tpu.dot_dimension_numbers<[1], [0], [0], [1], [0, 0, 1, 1], [], []>} : vector<8x256xbf16>, vector<256x150xbf16>, vector<8x150xf32> -> vector<8x150xf32>
    %c0_21 = arith.constant 0 : index
    %c0_22 = arith.constant 0 : index
    %68 = vector.load %arg9[%c0_21, %c0_22] : memref<1x150xf32, #tpu.memory_space<vmem>>, vector<1x150xf32>
    %69 = vector.broadcast %68 : vector<1x150xf32> to vector<8x150xf32>
    %70 = arith.addf %67, %69 : vector<8x150xf32>
    %cst_23 = arith.constant 0.000000e+00 : f32
    %71 = vector.broadcast %cst_23 : f32 to vector<8x150xf32>
    %72 = arith.maximumf %70, %71 : vector<8x150xf32>
    %73 = arith.truncf %72 : vector<8x150xf32> to vector<8x150xbf16>
    %c0_24 = arith.constant 0 : index
    %c0_25 = arith.constant 0 : index
    %74 = vector.load %arg10[%c0_24, %c0_25] : memref<150x150xbf16, #tpu.memory_space<vmem>>, vector<150x150xbf16>
    %cst_26 = arith.constant dense<0.000000e+00> : vector<8x150xf32>
    %75 = tpu.matmul %73, %74, %cst_26 {dimension_numbers = #tpu.dot_dimension_numbers<[1], [0], [0], [1], [0, 0, 1, 1], [], []>} : vector<8x150xbf16>, vector<150x150xbf16>, vector<8x150xf32> -> vector<8x150xf32>
    %c0_27 = arith.constant 0 : index
    %c0_28 = arith.constant 0 : index
    %76 = vector.load %arg11[%c0_27, %c0_28] : memref<1x150xf32, #tpu.memory_space<vmem>>, vector<1x150xf32>
    %77 = vector.broadcast %76 : vector<1x150xf32> to vector<8x150xf32>
    %78 = arith.addf %75, %77 : vector<8x150xf32>
    %cst_29 = arith.constant 0.000000e+00 : f32
    %79 = vector.broadcast %cst_29 : f32 to vector<8x150xf32>
    %80 = arith.maximumf %78, %79 : vector<8x150xf32>
    %81 = arith.truncf %80 : vector<8x150xf32> to vector<8x150xbf16>
    %c0_30 = arith.constant 0 : index
    %c0_31 = arith.constant 0 : index
    %82 = vector.load %arg12[%c0_30, %c0_31] : memref<150x128xbf16, #tpu.memory_space<vmem>>, vector<150x128xbf16>
    %cst_32 = arith.constant dense<0.000000e+00> : vector<8x128xf32>
    %83 = tpu.matmul %81, %82, %cst_32 {dimension_numbers = #tpu.dot_dimension_numbers<[1], [0], [0], [1], [0, 0, 1, 1], [], []>} : vector<8x150xbf16>, vector<150x128xbf16>, vector<8x128xf32> -> vector<8x128xf32>
    %c0_33 = arith.constant 0 : index
    %c0_34 = arith.constant 0 : index
    %84 = vector.load %arg13[%c0_33, %c0_34] : memref<1x128xf32, #tpu.memory_space<vmem>>, vector<1x128xf32>
    %85 = vector.broadcast %84 : vector<1x128xf32> to vector<8x128xf32>
    %86 = arith.addf %83, %85 : vector<8x128xf32>
    %87 = arith.truncf %86 : vector<8x128xf32> to vector<8x128xbf16>
    %c0_35 = arith.constant 0 : index
    %c0_36 = arith.constant 0 : index
    %88 = vector.load %arg14[%c0_35, %c0_36] : memref<128x50xbf16, #tpu.memory_space<vmem>>, vector<128x50xbf16>
    %cst_37 = arith.constant dense<0.000000e+00> : vector<8x50xf32>
    %89 = tpu.matmul %87, %88, %cst_37 {dimension_numbers = #tpu.dot_dimension_numbers<[1], [0], [0], [1], [0, 0, 1, 1], [], []>} : vector<8x128xbf16>, vector<128x50xbf16>, vector<8x50xf32> -> vector<8x50xf32>
    %c0_38 = arith.constant 0 : index
    %c0_39 = arith.constant 0 : index
    %90 = vector.load %arg15[%c0_38, %c0_39] : memref<1x50xf32, #tpu.memory_space<vmem>>, vector<1x50xf32>
    %91 = vector.broadcast %90 : vector<1x50xf32> to vector<8x50xf32>
    %92 = arith.addf %89, %91 : vector<8x50xf32>
    %cst_40 = arith.constant 0.000000e+00 : f32
    %93 = vector.broadcast %cst_40 : f32 to vector<8x50xf32>
    %94 = arith.maximumf %92, %93 : vector<8x50xf32>
    %95 = arith.truncf %94 : vector<8x50xf32> to vector<8x50xbf16>
    %c0_41 = arith.constant 0 : index
    %c0_42 = arith.constant 0 : index
    %96 = vector.load %arg16[%c0_41, %c0_42] : memref<50x10xbf16, #tpu.memory_space<vmem>>, vector<50x10xbf16>
    %cst_43 = arith.constant dense<0.000000e+00> : vector<8x10xf32>
    %97 = tpu.matmul %95, %96, %cst_43 {dimension_numbers = #tpu.dot_dimension_numbers<[1], [0], [0], [1], [0, 0, 1, 1], [], []>} : vector<8x50xbf16>, vector<50x10xbf16>, vector<8x10xf32> -> vector<8x10xf32>
    %c0_44 = arith.constant 0 : index
    %c0_45 = arith.constant 0 : index
    %98 = vector.load %arg17[%c0_44, %c0_45] : memref<1x10xf32, #tpu.memory_space<vmem>>, vector<1x10xf32>
    %99 = vector.broadcast %98 : vector<1x10xf32> to vector<8x10xf32>
    %100 = arith.addf %97, %99 : vector<8x10xf32>
    %cst_46 = arith.constant 0.000000e+00 : f32
    %101 = vector.broadcast %cst_46 : f32 to vector<8x10xf32>
    %102 = arith.maximumf %100, %101 : vector<8x10xf32>
    %103 = arith.truncf %102 : vector<8x10xf32> to vector<8x10xbf16>
    %c0_47 = arith.constant 0 : index
    %c0_48 = arith.constant 0 : index
    %104 = vector.load %arg18[%c0_47, %c0_48] : memref<10x128xbf16, #tpu.memory_space<vmem>>, vector<10x128xbf16>
    %cst_49 = arith.constant dense<0.000000e+00> : vector<8x128xf32>
    %105 = tpu.matmul %103, %104, %cst_49 {dimension_numbers = #tpu.dot_dimension_numbers<[1], [0], [0], [1], [0, 0, 1, 1], [], []>} : vector<8x10xbf16>, vector<10x128xbf16>, vector<8x128xf32> -> vector<8x128xf32>
    %c0_50 = arith.constant 0 : index
    %c0_51 = arith.constant 0 : index
    %106 = vector.load %arg19[%c0_50, %c0_51] : memref<1x128xf32, #tpu.memory_space<vmem>>, vector<1x128xf32>
    %107 = vector.broadcast %106 : vector<1x128xf32> to vector<8x128xf32>
    %108 = arith.addf %105, %107 : vector<8x128xf32>
    %109 = arith.addf %108, %86 : vector<8x128xf32>
    %c0_52 = arith.constant 0 : index
    %c0_53 = arith.constant 0 : index
    %110 = vector.load %arg20[%c0_52, %c0_53] : memref<8x128xf32, #tpu.memory_space<vmem>>, vector<8x128xf32>
    tpu.vector_store %arg20[%c0_52, %c0_53], %109 {strides = array<i32>} : memref<8x128xf32, #tpu.memory_space<vmem>>, vector<8x128xf32>,
    return
  }
  func.func @transform_0(%arg0: i32) -> (i32, i32) {
    %c0_i32 = arith.constant 0 : i32
    %c0_i32_0 = arith.constant 0 : i32
    return %arg0, %c0_i32 : i32, i32
  }
  func.func @transform_1(%arg0: i32) -> (i32, i32) {
    %c0_i32 = arith.constant 0 : i32
    %c0_i32_0 = arith.constant 0 : i32
    %c0_i32_1 = arith.constant 0 : i32
    return %c0_i32, %c0_i32_0 : i32, i32
  }
  func.func @transform_2(%arg0: i32) -> (i32, i32) {
    %c0_i32 = arith.constant 0 : i32
    %c0_i32_0 = arith.constant 0 : i32
    %c0_i32_1 = arith.constant 0 : i32
    return %c0_i32, %c0_i32_0 : i32, i32
  }
  func.func @transform_3(%arg0: i32) -> (i32, i32) {
    %c0_i32 = arith.constant 0 : i32
    %c0_i32_0 = arith.constant 0 : i32
    %c0_i32_1 = arith.constant 0 : i32
    return %c0_i32, %c0_i32_0 : i32, i32
  }
  func.func @transform_4(%arg0: i32) -> (i32, i32) {
    %c0_i32 = arith.constant 0 : i32
    %c0_i32_0 = arith.constant 0 : i32
    %c0_i32_1 = arith.constant 0 : i32
    return %c0_i32, %c0_i32_0 : i32, i32
  }
  func.func @transform_5(%arg0: i32) -> (i32, i32) {
    %c0_i32 = arith.constant 0 : i32
    %c0_i32_0 = arith.constant 0 : i32
    %c0_i32_1 = arith.constant 0 : i32
    return %c0_i32, %c0_i32_0 : i32, i32
  }
  func.func @transform_6(%arg0: i32) -> (i32, i32) {
    %c0_i32 = arith.constant 0 : i32
    %c0_i32_0 = arith.constant 0 : i32
    %c0_i32_1 = arith.constant 0 : i32
    return %c0_i32, %c0_i32_0 : i32, i32
  }
  func.func @transform_7(%arg0: i32) -> (i32, i32) {
    %c0_i32 = arith.constant 0 : i32
    %c0_i32_0 = arith.constant 0 : i32
    %c0_i32_1 = arith.constant 0 : i32
    return %c0_i32, %c0_i32_0 : i32, i32
  }
  func.func @transform_8(%arg0: i32) -> (i32, i32) {
    %c0_i32 = arith.constant 0 : i32
    %c0_i32_0 = arith.constant 0 : i32
    %c0_i32_1 = arith.constant 0 : i32
    return %c0_i32, %c0_i32_0 : i32, i32
  }
  func.func @transform_9(%arg0: i32) -> (i32, i32) {
    %c0_i32 = arith.constant 0 : i32
    %c0_i32_0 = arith.constant 0 : i32
    %c0_i32_1 = arith.constant 0 : i32
    return %c0_i32, %c0_i32_0 : i32, i32
  }
  func.func @transform_10(%arg0: i32) -> (i32, i32) {
    %c0_i32 = arith.constant 0 : i32
    %c0_i32_0 = arith.constant 0 : i32
    %c0_i32_1 = arith.constant 0 : i32
    return %c0_i32, %c0_i32_0 : i32, i32
  }
  func.func @transform_11(%arg0: i32) -> (i32, i32) {
    %c0_i32 = arith.constant 0 : i32
    %c0_i32_0 = arith.constant 0 : i32
    %c0_i32_1 = arith.constant 0 : i32
    return %c0_i32, %c0_i32_0 : i32, i32
  }
  func.func @transform_12(%arg0: i32) -> (i32, i32) {
    %c0_i32 = arith.constant 0 : i32
    %c0_i32_0 = arith.constant 0 : i32
    %c0_i32_1 = arith.constant 0 : i32
    return %c0_i32, %c0_i32_0 : i32, i32
  }
  func.func @transform_13(%arg0: i32) -> (i32, i32) {
    %c0_i32 = arith.constant 0 : i32
    %c0_i32_0 = arith.constant 0 : i32
    %c0_i32_1 = arith.constant 0 : i32
    return %c0_i32, %c0_i32_0 : i32, i32
  }
  func.func @transform_14(%arg0: i32) -> (i32, i32) {
    %c0_i32 = arith.constant 0 : i32
    %c0_i32_0 = arith.constant 0 : i32
    %c0_i32_1 = arith.constant 0 : i32
    return %c0_i32, %c0_i32_0 : i32, i32
  }
  func.func @transform_15(%arg0: i32) -> (i32, i32) {
    %c0_i32 = arith.constant 0 : i32
    %c0_i32_0 = arith.constant 0 : i32
    %c0_i32_1 = arith.constant 0 : i32
    return %c0_i32, %c0_i32_0 : i32, i32
  }
  func.func @transform_16(%arg0: i32) -> (i32, i32) {
    %c0_i32 = arith.constant 0 : i32
    %c0_i32_0 = arith.constant 0 : i32
    %c0_i32_1 = arith.constant 0 : i32
    return %c0_i32, %c0_i32_0 : i32, i32
  }
  func.func @transform_17(%arg0: i32) -> (i32, i32) {
    %c0_i32 = arith.constant 0 : i32
    %c0_i32_0 = arith.constant 0 : i32
    %c0_i32_1 = arith.constant 0 : i32
    return %c0_i32, %c0_i32_0 : i32, i32
  }
  func.func @transform_18(%arg0: i32) -> (i32, i32) {
    %c0_i32 = arith.constant 0 : i32
    %c0_i32_0 = arith.constant 0 : i32
    %c0_i32_1 = arith.constant 0 : i32
    return %c0_i32, %c0_i32_0 : i32, i32
  }
  func.func @transform_19(%arg0: i32) -> (i32, i32) {
    %c0_i32 = arith.constant 0 : i32
    %c0_i32_0 = arith.constant 0 : i32
    return %arg0, %c0_i32 : i32, i32
  }
}

</mosaic_0001>

<bundles_post_ra>
// kernel: _lambda_.1
= control target key start
LH: loop header
LB: loop body
LE: loop exit
PB: predicated region body
PF: predicated region fallthrough
CT: control target
= control target key end

     0   :  { %vm586_vm0 = vcmask 146432   ;;  %vm803_vm1 = vcmask 1040384   ;;  %vm1788_vm2 = vcmask 523264   ;;  %vm3000_vm3 = vcmask 1042432   ;;  %s5919_s1 = inlined_call_operand.vmem [shape: bf16[18,64], index: 1, kind: input, shape index: {}]   ;;  %s5920_s0 = inlined_call_operand.vmem [shape: bf16[1152,18], index: 0, kind: input, shape index: {}]   ;;  %s5921_s2 = inlined_call_operand.vmem [shape: f32[1,64], index: 2, kind: input, shape index: {}]   ;;  %s5922_s3 = inlined_call_operand.vmem [shape: bf16[256,128], index: 3, kind: input, shape index: {}]   ;;  %s5923_s5 = inlined_call_operand.vmem [shape: bf16[512,256], index: 5, kind: input, shape index: {}]   ;;  %s5924_s4 = inlined_call_operand.vmem [shape: f32[1,128], index: 4, kind: input, shape index: {}]   ;;  %s5925_s9 = inlined_call_operand.vmem [shape: bf16[150,150], index: 9, kind: input, shape index: {}]   ;;  %s5926_s7 = inlined_call_operand.vmem [shape: bf16[256,150], index: 7, kind: input, shape index: {}]   ;;  %s5927_s6 = inlined_call_operand.vmem [shape: f32[1,256], index: 6, kind: input, shape index: {}]   ;;  %s5928_s11 = inlined_call_operand.vmem [shape: bf16[150,128], index: 11, kind: input, shape index: {}]   ;;  %s5929_s8 = inlined_call_operand.vmem [shape: f32[1,150], index: 8, kind: input, shape index: {}]   ;;  %s5930_s13 = inlined_call_operand.vmem [shape: bf16[128,50], index: 13, kind: input, shape index: {}]   ;;  %s5931_s10 = inlined_call_operand.vmem [shape: f32[1,150], index: 10, kind: input, shape index: {}]   ;;  %s5932_s15 = inlined_call_operand.vmem [shape: bf16[50,10], index: 15, kind: input, shape index: {}]   ;;  %s5933_s12 = inlined_call_operand.vmem [shape: f32[1,128], index: 12, kind: input, shape index: {}]   ;;  %s5934_s17 = inlined_call_operand.vmem [shape: bf16[10,128], index: 17, kind: input, shape index: {}]   ;;  %s5935_s14 = inlined_call_operand.vmem [shape: f32[1,50], index: 14, kind: input, shape index: {}]   ;;  %s5936_s16 = inlined_call_operand.vmem [shape: f32[1,10], index: 16, kind: input, shape index: {}]   ;;  %s5937_s18 = inlined_call_operand.vmem [shape: f32[1,128], index: 18, kind: input, shape index: {}]   ;;  %s5938_s19 = inlined_call_operand.vmem [shape: f32[8,128], index: 19, kind: output, shape index: {}]  }
   0x1   :  { %5943 = sst [smem:[#allocation2_spill]] %s5919_s1  ;;  %vm2996_vm4 = vcmask 179200   ;;  %vm4500_vm5 = vmmov 0   ;;  %vm3397_vm6 = vcmask 1044480   ;;  %vm3330_vm7 = vcmask 408576  }
   0x2   :  { %5944 = sst [smem:[#allocation3_spill]] %s5920_s0  ;;  %s5947_s20 = sld [smem:[#allocation2_spill]]  ;;  %vm3393_vm8 = vcmask 80896  }
   0x3   :  { %5945 = sst [smem:[#allocation4_spill]] %s5921_s2  ;;  %s5948_s23 = sld [smem:[#allocation3_spill]] }
   0x4   :  { %5946 = sst [smem:[#allocation5_spill]] %s5922_s3  ;;  %s5949_s21 = sld [smem:[#allocation4_spill]] }
   0x5   :  { %s5950_s27 = sld [smem:[#allocation5_spill]] }
   0x8   :  { %v4210_v0 = vld [vmem:[%s5947_s20] sm:$0xff]   ;;  %v4211_v1 = vld [vmem:[%s5947_s20 + $0x8] ss:$0 sps:$4 sm:$0x11]  }
   0x9   :  { %v4212_v2 = vld [vmem:[%s5948_s23] sm:$0xff]   ;;  %3943 = vmatprep.subr.bf16.mxu0 %v4210_v0  ;;  %v805_v3 = vsel %vm803_vm1, %v4211_v1, 0  ;;  %v4213_v4 = vld [vmem:[%s5948_s23 + $0x8] sm:$0xff]   ;;  %v4214_v5 = vld [vmem:[%s5948_s23 + $0x10] sm:$0xff]  }
   0xa   :  { %3944 = vmatpush3.bf16.msra.mxu0 %v4210_v0  ;;  %3947 = vmatprep.mubr.msk.bf16.mxu0 %vm586_vm0, %v4212_v2  ;;  %v4215_v6 = vld [vmem:[%s5948_s23 + $0x18] sm:$0xff]   ;;  %v4216_v7 = vld [vmem:[%s5948_s23 + $0x20] sm:$0xff]   ;;  %v4217_v8 = vld [vmem:[%s5948_s23 + $0x28] sm:$0xff]  }
   0xb   :  { %4135 = vmatprep.subr.msk.bf16.mxu0 %vm803_vm1, %v4211_v1  ;;  %v4218_v9 = vld [vmem:[%s5948_s23 + $0x30] sm:$0xff]   ;;  %v4219_v10 = vld [vmem:[%s5948_s23 + $0x38] sm:$0xff]   ;;  %v4220_v11 = vld [vmem:[%s5948_s23 + $0x40] sm:$0xff]  }
   0xc   :  { %v4221_v12 = vld [vmem:[%s5948_s23 + $0x48] sm:$0xff]   ;;  %v4222_v13 = vld [vmem:[%s5948_s23 + $0x50] sm:$0xff]   ;;  %v4223_v14 = vld [vmem:[%s5948_s23 + $0x58] sm:$0xff]  }
   0xd   :  { %v4224_v15 = vld [vmem:[%s5948_s23 + $0x60] sm:$0xff]   ;;  %v4225_v16 = vld [vmem:[%s5948_s23 + $0x68] sm:$0xff]   ;;  %v4226_v17 = vld [vmem:[%s5948_s23 + $0x70] sm:$0xff]  }
   0xe   :  { %3946 = vmatpush3.bf16.msra.mxu0 %v805_v3  ;;  %v4227_v18 = vld [vmem:[%s5948_s23 + $0x78] sm:$0xff]   ;;  %v4228_v19 = vld [vmem:[%s5948_s23 + $0x80] sm:$0xff]   ;;  %v4229_v20 = vld [vmem:[%s5948_s23 + $0x88] sm:$0xff]  }
   0xf   :  { %v4230_v21 = vld [vmem:[%s5948_s23 + $0x90] sm:$0xff]   ;;  %v4231_v22 = vld [vmem:[%s5948_s23 + $0x98] sm:$0xff]   ;;  %v4232_v23 = vld [vmem:[%s5948_s23 + $0xa0] sm:$0xff]  }
  0x10   :  { %v4233_v24 = vld [vmem:[%s5948_s23 + $0xa8] sm:$0xff]   ;;  %v4234_v25 = vld [vmem:[%s5948_s23 + $0xb0] sm:$0xff]   ;;  %v4235_v26 = vld [vmem:[%s5948_s23 + $0xb8] sm:$0xff]  }
  0x11   :  { %3948 = vmatmul.mubr.msk.bf16.vlgmr.msra.gmra.mrb[0].mxu0 %vm586_vm0, %v4213_v4  ;;  %v4236_v27 = vld [vmem:[%s5948_s23 + $0xc0] sm:$0xff]   ;;  %v4237_v28 = vld [vmem:[%s5948_s23 + $0xc8] sm:$0xff]   ;;  %v4238_v29 = vld [vmem:[%s5948_s23 + $0xd0] sm:$0xff]  }
  0x12   :  { %3951 = vmatprep.mubr.msk.bf16.mxu0 %vm586_vm0, %v4214_v5  ;;  %v4239_v30 = vld [vmem:[%s5948_s23 + $0xd8] sm:$0xff]   ;;  %v4240_v31 = vld [vmem:[%s5948_s23 + $0xe0] sm:$0xff]   ;;  %v4241_v32 = vld [vmem:[%s5948_s23 + $0xe8] sm:$0xff]  }
  0x13   :  { %v4242_v33 = vld [vmem:[%s5948_s23 + $0xf0] sm:$0xff]   ;;  %v4243_v34 = vld [vmem:[%s5948_s23 + $0xf8] sm:$0xff]   ;;  %v4244_v35 = vld [vmem:[%s5948_s23 + $0x100] sm:$0xff]  }
  0x14   :  { %v4245_v36 = vld [vmem:[%s5948_s23 + $0x108] sm:$0xff]   ;;  %v4246_v37 = vld [vmem:[%s5948_s23 + $0x110] sm:$0xff]   ;;  %v4247_v38 = vld [vmem:[%s5948_s23 + $0x118] sm:$0xff]  }
  0x15   :  { %v4248_v39 = vld [vmem:[%s5948_s23 + $0x120] sm:$0xff]   ;;  %v4249_v40 = vld [vmem:[%s5948_s23 + $0x128] sm:$0xff]   ;;  %v4250_v41 = vld [vmem:[%s5948_s23 + $0x130] sm:$0xff]  }
  0x16   :  { %v4251_v42 = vld [vmem:[%s5948_s23 + $0x138] sm:$0xff]   ;;  %v4252_v43 = vld [vmem:[%s5948_s23 + $0x140] sm:$0xff]   ;;  %v4253_v44 = vld [vmem:[%s5948_s23 + $0x148] sm:$0xff]  }
  0x17   :  { %v4254_v45 = vld [vmem:[%s5948_s23 + $0x150] sm:$0xff]   ;;  %v4255_v46 = vld [vmem:[%s5948_s23 + $0x158] sm:$0xff]   ;;  %v4256_v47 = vld [vmem:[%s5948_s23 + $0x160] sm:$0xff]  }
  0x18   :  { %v4257_v48 = vld [vmem:[%s5948_s23 + $0x168] sm:$0xff]   ;;  %v4258_v49 = vld [vmem:[%s5948_s23 + $0x170] sm:$0xff]   ;;  %v4259_v50 = vld [vmem:[%s5948_s23 + $0x178] sm:$0xff]  }
  0x19   :  { %3952 = vmatmul.mubr.msk.bf16.gmra.mrb[4].mxu0 %vm586_vm0, %v4215_v6  ;;  %v4260_v51 = vld [vmem:[%s5948_s23 + $0x180] sm:$0xff]   ;;  %v4261_v52 = vld [vmem:[%s5948_s23 + $0x188] sm:$0xff]   ;;  %v4262_v53 = vld [vmem:[%s5948_s23 + $0x190] sm:$0xff]  }
  0x1a   :  { %3955 = vmatprep.mubr.msk.bf16.mxu0 %vm586_vm0, %v4216_v7  ;;  %v4263_v54 = vld [vmem:[%s5948_s23 + $0x198] sm:$0xff]   ;;  %v4264_v55 = vld [vmem:[%s5948_s23 + $0x1a0] sm:$0xff]   ;;  %v4265_v56 = vld [vmem:[%s5948_s23 + $0x1a8] sm:$0xff]  }
  0x1b   :  { %v4266_v57 = vld [vmem:[%s5948_s23 + $0x1b0] sm:$0xff]   ;;  %v4267_v60 = vld [vmem:[%s5948_s23 + $0x1b8] sm:$0xff]   ;;  %v4268_v62 = vld [vmem:[%s5948_s23 + $0x1c0] sm:$0xff]  }
  0x1c   :  { %v4269_v2 = vld [vmem:[%s5948_s23 + $0x1c8] sm:$0xff]   ;;  %v4270_v4 = vld [vmem:[%s5948_s23 + $0x1d0] sm:$0xff]  }
  0x21   :  { %3956 = vmatmul.mubr.msk.bf16.gmra.mrb[8].mxu0 %vm586_vm0, %v4217_v8  ;;  %v4271_v8 = vld [vmem:[%s5948_s23 + $0x1d8] sm:$0xff]  }
  0x22   :  { %3959 = vmatprep.mubr.msk.bf16.mxu0 %vm586_vm0, %v4218_v9 }
  0x29   :  { %3960 = vmatmul.mubr.msk.bf16.gmra.mrb[12].mxu0 %vm586_vm0, %v4219_v10  ;;  %v4272_v10 = vld [vmem:[%s5948_s23 + $0x1e0] sm:$0xff]  }
  0x2a   :  { %3963 = vmatprep.mubr.msk.bf16.mxu0 %vm586_vm0, %v4220_v11 }
  0x31   :  { %3964 = vmatmul.mubr.msk.bf16.gmra.mrb[16].mxu0 %vm586_vm0, %v4221_v12  ;;  %v4862_v12 = vld [vmem:[%s5949_s21] ss:$0 sm:$0xff] }
  0x32   :  { %3967 = vmatprep.mubr.msk.bf16.mxu0 %vm586_vm0, %v4222_v13 }
  0x39   :  { %3968 = vmatmul.mubr.msk.bf16.gmra.mrb[20].mxu0 %vm586_vm0, %v4223_v14 }
  0x3a   :  { %3971 = vmatprep.mubr.msk.bf16.mxu0 %vm586_vm0, %v4224_v15 }
  0x41   :  { %3972 = vmatmul.mubr.msk.bf16.gmra.mrb[24].mxu0 %vm586_vm0, %v4225_v16 }
  0x42   :  { %3975 = vmatprep.mubr.msk.bf16.mxu0 %vm586_vm0, %v4226_v17 }
  0x49   :  { %3976 = vmatmul.mubr.msk.bf16.gmra.mrb[28].mxu0 %vm586_vm0, %v4227_v18 }
  0x4a   :  { %3979 = vmatprep.mubr.msk.bf16.mxu0 %vm586_vm0, %v4228_v19  ;;  %v4273_v19 = vld [vmem:[%s5948_s23 + $0x1e8] sm:$0xff]  }
  0x51   :  { %3980 = vmatmul.mubr.msk.bf16.gmra.mrb[32].mxu0 %vm586_vm0, %v4229_v20 }
  0x52   :  { %3983 = vmatprep.mubr.msk.bf16.mxu0 %vm586_vm0, %v4230_v21 }
  0x59   :  { %3984 = vmatmul.mubr.msk.bf16.gmra.mrb[36].mxu0 %vm586_vm0, %v4231_v22 }
  0x5a   :  { %3987 = vmatprep.mubr.msk.bf16.mxu0 %vm586_vm0, %v4232_v23  ;;  %v4274_v23 = vld [vmem:[%s5948_s23 + $0x1f0] sm:$0xff]  }
  0x61   :  { %3988 = vmatmul.mubr.msk.bf16.gmra.mrb[40].mxu0 %vm586_vm0, %v4233_v24 }
  0x62   :  { %3991 = vmatprep.mubr.msk.bf16.mxu0 %vm586_vm0, %v4234_v25 }
  0x69   :  { %3992 = vmatmul.mubr.msk.bf16.gmra.mrb[44].mxu0 %vm586_vm0, %v4235_v26 }
  0x6a   :  { %3995 = vmatprep.mubr.msk.bf16.mxu0 %vm586_vm0, %v4236_v27 }
  0x71   :  { %3996 = vmatmul.mubr.msk.bf16.gmra.mrb[48].mxu0 %vm586_vm0, %v4237_v28 }
  0x72   :  { %3999 = vmatprep.mubr.msk.bf16.mxu0 %vm586_vm0, %v4238_v29 }
  0x79   :  { %4000 = vmatmul.mubr.msk.bf16.gmra.mrb[52].mxu0 %vm586_vm0, %v4239_v30 }
  0x7a   :  { %4003 = vmatprep.mubr.msk.bf16.mxu0 %vm586_vm0, %v4240_v31 }
  0x81   :  { %4004 = vmatmul.mubr.msk.bf16.gmra.mrb[56].mxu0 %vm586_vm0, %v4241_v32 }
  0x82   :  { %4007 = vmatprep.mubr.msk.bf16.mxu0 %vm586_vm0, %v4242_v33 }
  0x89   :  { %4008 = vmatmul.mubr.msk.bf16.gmra.mrb[60].mxu0 %vm586_vm0, %v4243_v34 }
  0x8a   :  { %4011 = vmatprep.mubr.msk.bf16.mxu0 %vm586_vm0, %v4244_v35 }
  0x91   :  { %4012 = vmatmul.mubr.msk.bf16.gmra.mrb[64].mxu0 %vm586_vm0, %v4245_v36 }
  0x92   :  { %4015 = vmatprep.mubr.msk.bf16.mxu0 %vm586_vm0, %v4246_v37 }
  0x99   :  { %4016 = vmatmul.mubr.msk.bf16.gmra.mrb[68].mxu0 %vm586_vm0, %v4247_v38 }
  0x9a   :  { %4019 = vmatprep.mubr.msk.bf16.mxu0 %vm586_vm0, %v4248_v39 }
  0xa1   :  { %4020 = vmatmul.mubr.msk.bf16.gmra.mrb[72].mxu0 %vm586_vm0, %v4249_v40 }
  0xa2   :  { %4023 = vmatprep.mubr.msk.bf16.mxu0 %vm586_vm0, %v4250_v41 }
  0xa9   :  { %4024 = vmatmul.mubr.msk.bf16.gmra.mrb[76].mxu0 %vm586_vm0, %v4251_v42 }
  0xaa   :  { %4027 = vmatprep.mubr.msk.bf16.mxu0 %vm586_vm0, %v4252_v43 }
  0xb1   :  { %4028 = vmatmul.mubr.msk.bf16.gmra.mrb[80].mxu0 %vm586_vm0, %v4253_v44 }
  0xb2   :  { %4031 = vmatprep.mubr.msk.bf16.mxu0 %vm586_vm0, %v4254_v45 }
  0xb9   :  { %4032 = vmatmul.mubr.msk.bf16.gmra.mrb[84].mxu0 %vm586_vm0, %v4255_v46  ;;  %v4275_v46 = vld [vmem:[%s5948_s23 + $0x1f8] sm:$0xff]  }
  0xba   :  { %4035 = vmatprep.mubr.msk.bf16.mxu0 %vm586_vm0, %v4256_v47 }
  0xc1   :  { %4036 = vmatmul.mubr.msk.bf16.gmra.mrb[88].mxu0 %vm586_vm0, %v4257_v48 }
  0xc2   :  { %4039 = vmatprep.mubr.msk.bf16.mxu0 %vm586_vm0, %v4258_v49 }
  0xc9   :  { %4040 = vmatmul.mubr.msk.bf16.gmra.mrb[92].mxu0 %vm586_vm0, %v4259_v50 }
  0xca   :  { %4043 = vmatprep.mubr.msk.bf16.mxu0 %vm586_vm0, %v4260_v51  ;;  %v4276_v51 = vld [vmem:[%s5948_s23 + $0x200] sm:$0xff]  }
  0xd1   :  { %4044 = vmatmul.mubr.msk.bf16.gmra.mrb[96].mxu0 %vm586_vm0, %v4261_v52 }
  0xd2   :  { %4047 = vmatprep.mubr.msk.bf16.mxu0 %vm586_vm0, %v4262_v53 }
  0xd9   :  { %4048 = vmatmul.mubr.msk.bf16.gmra.mrb[100].mxu0 %vm586_vm0, %v4263_v54 }
  0xda   :  { %4051 = vmatprep.mubr.msk.bf16.mxu0 %vm586_vm0, %v4264_v55 }
  0xe1   :  { %4052 = vmatmul.mubr.msk.bf16.gmra.mrb[104].mxu0 %vm586_vm0, %v4265_v56 }
  0xe2   :  { %4055 = vmatprep.mubr.msk.bf16.mxu0 %vm586_vm0, %v4266_v57 }
  0xe4   :  { %v3949_v58 = vpop.f32.mrb[0].mxu0 }
  0xe5   :  { %v841_v59 = vpop.f32.mrb[1].mxu0  ;;  %v850_v13 = vadd.f32 %v3949_v58, %v4862_v12 }
  0xe6   :  { %v3950_v61 = vpop.f32.mrb[2].mxu0  ;;  %v842_v14 = vadd.f32 %v4862_v12, %v841_v59 }
  0xe7   :  { %v844_v63 = vpop.f32.mrb[3].mxu0  ;;  %v853_v16 = vadd.f32 %v3950_v61, %v4862_v12  ;;  %v1418_v24 = vmax.f32 %v850_v13, 0.0 }
  0xe8   :  { %v845_v20 = vadd.f32 %v4862_v12, %v844_v63  ;;  %v1416_v28 = vmax.f32 %v842_v14, 0.0 }
  0xe9   :  { %4056 = vmatmul.mubr.msk.bf16.gmra.mrb[108].mxu0 %vm586_vm0, %v4267_v60  ;;  %v1419_v31 = vmax.f32 %v853_v16, 0.0 }
  0xea   :  { %4059 = vmatprep.mubr.msk.bf16.mxu0 %vm586_vm0, %v4268_v62  ;;  %v1417_v34 = vmax.f32 %v845_v20, 0.0 }
  0xec   :  { %v3953_v0 = vpop.f32.mrb[4].mxu0 }
  0xed   :  { %v857_v1 = vpop.f32.mrb[5].mxu0  ;;  %v866_v37 = vadd.f32 %v3953_v0, %v4862_v12 }
  0xee   :  { %v3954_v3 = vpop.f32.mrb[6].mxu0  ;;  %v858_v39 = vadd.f32 %v4862_v12, %v857_v1 }
  0xef   :  { %v860_v5 = vpop.f32.mrb[7].mxu0  ;;  %v869_v42 = vadd.f32 %v3954_v3, %v4862_v12  ;;  %v1422_v52 = vmax.f32 %v866_v37, 0.0 }
  0xf0   :  { %v861_v47 = vadd.f32 %v4862_v12, %v860_v5  ;;  %v1420_v56 = vmax.f32 %v858_v39, 0.0  ;;  %v4280_v39 = vld [vmem:[%s5948_s23 + $0x220] sm:$0xff]  }
  0xf1   :  { %4060 = vmatmul.mubr.msk.bf16.gmra.mrb[112].mxu0 %vm586_vm0, %v4269_v2  ;;  %v1423_v59 = vmax.f32 %v869_v42, 0.0  ;;  %v4281_v42 = vld [vmem:[%s5948_s23 + $0x228] sm:$0xff]  }
  0xf2   :  { %4063 = vmatprep.mubr.msk.bf16.mxu0 %vm586_vm0, %v4270_v4  ;;  %v1421_v62 = vmax.f32 %v861_v47, 0.0  ;;  %v4285_v47 = vld [vmem:[%s5950_s27] sm:$0xff]  }
  0xf4   :  { %v4845_v6 = vpop.f32.mrb[8].mxu0 }
  0xf5   :  { %v4847_v7 = vpop.f32.mrb[9].mxu0  ;;  %v882_v1 = vadd.f32 %v4845_v6, %v4862_v12 }
  0xf6   :  { %v4852_v9 = vpop.f32.mrb[10].mxu0  ;;  %v874_v3 = vadd.f32 %v4862_v12, %v4847_v7 }
  0xf7   :  { %v4857_v11 = vpop.f32.mrb[11].mxu0 }
  0xf8   :  { %v877_v6 = vadd.f32 %v4862_v12, %v4857_v11 }
  0xf9   :  { %4064 = vmatmul.mubr.msk.bf16.gmra.mrb[116].mxu0 %vm586_vm0, %v4271_v8  ;;  %v885_v8 = vadd.f32 %v4852_v9, %v4862_v12  ;;  %v4278_v9 = vld [vmem:[%s5948_s23 + $0x210] sm:$0xff]  }
  0xfa   :  { %4067 = vmatprep.mubr.msk.bf16.mxu0 %vm586_vm0, %v4272_v10 }
  0xfc   :  { %v3961_v15 = vpop.f32.mrb[12].mxu0 }
  0xfd   :  { %v898_v17 = vadd.f32 %v3961_v15, %v4862_v12  ;;  %v889_v18 = vpop.f32.mrb[13].mxu0  ;;  %v4277_v15 = vld [vmem:[%s5948_s23 + $0x208] sm:$0xff]  }
  0xfe   :  { %v890_v21 = vadd.f32 %v4862_v12, %v889_v18  ;;  %v3962_v22 = vpop.f32.mrb[14].mxu0  ;;  %v1426_v18 = vmax.f32 %v882_v1, 0.0 }
  0xff   :  { %v1430_v25 = vmax.f32 %v898_v17, 0.0  ;;  %v901_v26 = vadd.f32 %v3962_v22, %v4862_v12  ;;  %v892_v27 = vpop.f32.mrb[15].mxu0  ;;  %v1424_v22 = vmax.f32 %v874_v3, 0.0 }
 0x100   :  { %v1428_v29 = vmax.f32 %v890_v21, 0.0  ;;  %v893_v30 = vadd.f32 %v4862_v12, %v892_v27  ;;  %v1425_v27 = vmax.f32 %v877_v6, 0.0 }
 0x101   :  { %v1562_v32 = vmax.f32 %v1418_v24, %v1430_v25  ;;  %v1431_v33 = vmax.f32 %v901_v26, 0.0  ;;  %4068 = vmatmul.mubr.msk.bf16.gmra.mrb[120].mxu0 %vm586_vm0, %v4273_v19  ;;  %v1427_v25 = vmax.f32 %v885_v8, 0.0  ;;  %v4293_v8 = vld [vmem:[%s5950_s27 + $0x20] sm:$0xff]  }
 0x102   :  { %v4881_v35 = vmax.f32 %v1416_v28, %v1428_v29  ;;  %v1429_v36 = vmax.f32 %v893_v30, 0.0  ;;  %4071 = vmatprep.mubr.msk.bf16.mxu0 %vm586_vm0, %v4274_v23 }
 0x103   :  { %v1563_v38 = vmax.f32 %v1419_v31, %v1431_v33 }
 0x104   :  { %v4886_v40 = vmax.f32 %v1417_v34, %v1429_v36  ;;  %v3965_v41 = vpop.f32.mrb[16].mxu0  ;;  %v4279_v34 = vld [vmem:[%s5948_s23 + $0x218] sm:$0xff]  }
 0x105   :  { %v4889_v43 = vmax.f32 %v1562_v32, %v1563_v38  ;;  %v914_v44 = vadd.f32 %v3965_v41, %v4862_v12  ;;  %v905_v45 = vpop.f32.mrb[17].mxu0 }
 0x106   :  { %v1632_v48 = vmax.f32 %v4881_v35, %v4886_v40  ;;  %v906_v49 = vadd.f32 %v4862_v12, %v905_v45  ;;  %v3966_v50 = vpop.f32.mrb[18].mxu0  ;;  %v4284_v45 = vld [vmem:[%s5950_s27 + $0x40] sm:$0xff]  }
 0x107   :  { %v1434_v53 = vmax.f32 %v914_v44, 0.0  ;;  %v917_v54 = vadd.f32 %v3966_v50, %v4862_v12  ;;  %v908_v55 = vpop.f32.mrb[19].mxu0  ;;  %v4282_v50 = vld [vmem:[%s5948_s23 + $0x230] sm:$0xff]   ;;  %3833 = vmatprep.subr.bf16.mxu1 %v4284_v45 }
 0x108   :  { %v1432_v57 = vmax.f32 %v906_v49, 0.0  ;;  %v909_v58 = vadd.f32 %v4862_v12, %v908_v55  ;;  %3834 = vmatpush3.bf16.msra.mxu1 %v4285_v47 }
 0x109   :  { %v1566_v60 = vmax.f32 %v1422_v52, %v1434_v53  ;;  %v1435_v61 = vmax.f32 %v917_v54, 0.0  ;;  %4072 = vmatmul.mubr.msk.bf16.gmra.mrb[124].mxu0 %vm586_vm0, %v4275_v46  ;;  %v4286_v52 = vld [vmem:[%s5950_s27 + $0x48] sm:$0xff]   ;;  %v4283_v54 = vld [vmem:[%s5948_s23 + $0x238] sm:$0xff]  }
 0x10a   :  { %v1564_v63 = vmax.f32 %v1420_v56, %v1432_v57  ;;  %v1433_v0 = vmax.f32 %v909_v58, 0.0  ;;  %4075 = vmatprep.mubr.msk.bf16.mxu0 %vm586_vm0, %v4276_v51  ;;  %v4287_v53 = vld [vmem:[%s5950_s27 + $0x8] sm:$0xff]   ;;  %3835 = vmatprep.subr.bf16.mxu1 %v4286_v52  ;;  %v4288_v56 = vld [vmem:[%s5950_s27 + $0x50] sm:$0xff]  }
 0x10b   :  { %v1567_v2 = vmax.f32 %v1423_v59, %v1435_v61  ;;  %v4289_v58 = vld [vmem:[%s5950_s27 + $0x10] sm:$0xff]   ;;  %v4290_v61 = vld [vmem:[%s5950_s27 + $0x58] sm:$0xff]  }
 0x10c   :  { %v1565_v4 = vmax.f32 %v1421_v62, %v1433_v0  ;;  %v3969_v5 = vpop.f32.mrb[20].mxu0  ;;  %3836 = vmatpush3.bf16.msra.mxu1 %v4287_v53  ;;  %v4291_v62 = vld [vmem:[%s5950_s27 + $0x18] sm:$0xff]  }
 0x10d   :  { %v4912_v10 = vmax.f32 %v1566_v60, %v1567_v2  ;;  %v930_v13 = vadd.f32 %v3969_v5, %v4862_v12  ;;  %v921_v14 = vpop.f32.mrb[21].mxu0  ;;  %3837 = vmatprep.subr.bf16.mxu1 %v4288_v56  ;;  %v4292_v2 = vld [vmem:[%s5950_s27 + $0x60] sm:$0xff]  }
 0x10e   :  { %v4920_v16 = vmax.f32 %v1564_v63, %v1565_v4  ;;  %v922_v7 = vadd.f32 %v4862_v12, %v921_v14  ;;  %v3970_v17 = vpop.f32.mrb[22].mxu0 }
 0x10f   :  { %v1438_v19 = vmax.f32 %v930_v13, 0.0  ;;  %v933_v20 = vadd.f32 %v3970_v17, %v4862_v12  ;;  %v924_v21 = vpop.f32.mrb[23].mxu0 }
 0x110   :  { %v1436_v23 = vmax.f32 %v922_v7, 0.0  ;;  %v925_v24 = vadd.f32 %v4862_v12, %v924_v21  ;;  %3838 = vmatpush3.bf16.msra.mxu1 %v4289_v58  ;;  %v4294_v21 = vld [vmem:[%s5950_s27 + $0x68] sm:$0xff]  }
 0x111   :  { %v4928_v11 = vmax.f32 %v1426_v18, %v1438_v19  ;;  %v1439_v26 = vmax.f32 %v933_v20, 0.0  ;;  %4076 = vmatmul.mubr.msk.bf16.gmra.mrb[128].mxu0 %vm586_vm0, %v4277_v15  ;;  %3839 = vmatprep.subr.bf16.mxu1 %v4290_v61 }
 0x112   :  { %v1568_v28 = vmax.f32 %v1424_v22, %v1436_v23  ;;  %v1437_v29 = vmax.f32 %v925_v24, 0.0  ;;  %4079 = vmatprep.mubr.msk.bf16.mxu0 %vm586_vm0, %v4278_v9 }
 0x113   :  { %v4932_v30 = vmax.f32 %v1427_v25, %v1439_v26  ;;  %v4295_v25 = vld [vmem:[%s5950_s27 + $0x28] sm:$0xff]  }
 0x114   :  { %v1569_v31 = vmax.f32 %v1425_v27, %v1437_v29  ;;  %v3973_v32 = vpop.f32.mrb[24].mxu0  ;;  %3840 = vmatpush3.bf16.msra.mxu1 %v4291_v62 }
 0x115   :  { %v937_v33 = vpop.f32.mrb[25].mxu0  ;;  %v1637_v36 = vmax.f32 %v4928_v11, %v4932_v30  ;;  %v946_v63 = vadd.f32 %v3973_v32, %v4862_v12  ;;  %3841 = vmatprep.subr.bf16.mxu1 %v4292_v2  ;;  %v4299_v2 = vld [vmem:[%s5950_s27 + $0x38] sm:$0xff]  }
 0x116   :  { %v4939_v37 = vmax.f32 %v1568_v28, %v1569_v31  ;;  %v3974_v38 = vpop.f32.mrb[26].mxu0  ;;  %v938_v0 = vadd.f32 %v4862_v12, %v937_v33 }
 0x117   :  { %v940_v41 = vpop.f32.mrb[27].mxu0  ;;  %v949_v3 = vadd.f32 %v3974_v38, %v4862_v12  ;;  %v1442_v6 = vmax.f32 %v946_v63, 0.0  ;;  %v4296_v38 = vld [vmem:[%s5950_s27 + $0x70] sm:$0xff]  }
 0x118   :  { %v941_v13 = vadd.f32 %v4862_v12, %v940_v41  ;;  %3842 = vmatpush3.bf16.msra.mxu1 %v4293_v8  ;;  %v1440_v18 = vmax.f32 %v938_v0, 0.0 }
 0x119   :  { %4080 = vmatmul.mubr.msk.bf16.gmra.mrb[132].mxu0 %vm586_vm0, %v4279_v34  ;;  %v1443_v22 = vmax.f32 %v949_v3, 0.0  ;;  %3843 = vmatprep.subr.bf16.mxu1 %v4294_v21 }
 0x11a   :  { %4083 = vmatprep.mubr.msk.bf16.mxu0 %vm586_vm0, %v4280_v39  ;;  %v1441_v26 = vmax.f32 %v941_v13, 0.0 }
 0x11c   :  { %v3977_v44 = vpop.f32.mrb[28].mxu0  ;;  %3844 = vmatpush3.bf16.msra.mxu1 %v4295_v25 }
 0x11d   :  { %v953_v46 = vpop.f32.mrb[29].mxu0  ;;  %v962_v29 = vadd.f32 %v3977_v44, %v4862_v12  ;;  %v4297_v44 = vld [vmem:[%s5950_s27 + $0x30] sm:$0xff]   ;;  %3845 = vmatprep.subr.bf16.mxu1 %v4296_v38 }
 0x11e   :  { %v3978_v49 = vpop.f32.mrb[30].mxu0  ;;  %v954_v32 = vadd.f32 %v4862_v12, %v953_v46 }
 0x11f   :  { %v4958_v51 = vpop.f32.mrb[31].mxu0  ;;  %v965_v39 = vadd.f32 %v3978_v49, %v4862_v12  ;;  %v1446_v49 = vmax.f32 %v962_v29, 0.0 }
 0x120   :  { %v957_v46 = vadd.f32 %v4862_v12, %v4958_v51  ;;  %3846 = vmatpush3.bf16.msra.mxu1 %v4297_v44  ;;  %v1444_v58 = vmax.f32 %v954_v32, 0.0  ;;  %v4298_v51 = vld [vmem:[%s5950_s27 + $0x78] sm:$0xff]   ;;  %s4497_s27 = smov 64   ;;  %v4145_v44 = vpack.i.bf16 %v4920_v16, %v4889_v43 }
 0x121   :  { %4084 = vmatmul.mubr.msk.bf16.gmra.mrb[136].mxu0 %vm586_vm0, %v4281_v42  ;;  %v1447_v63 = vmax.f32 %v965_v39, 0.0  ;;  %3847 = vmatprep.subr.bf16.mxu1 %v4298_v51 }
 0x122   :  { %4087 = vmatprep.mubr.msk.bf16.mxu0 %vm586_vm0, %v4282_v50  ;;  %v1445_v3 = vmax.f32 %v957_v46, 0.0 }
 0x124   :  { %v4971_v55 = vpop.f32.mrb[32].mxu0  ;;  %3848 = vmatpush3.bf16.msra.mxu1 %v4299_v2 }
 0x125   :  { %v4976_v57 = vpop.f32.mrb[33].mxu0  ;;  %v978_v8 = vadd.f32 %v4971_v55, %v4862_v12 }
 0x126   :  { %v4981_v59 = vpop.f32.mrb[34].mxu0 }
 0x127   :  { %v4983_v60 = vpop.f32.mrb[35].mxu0 }
 0x129   :  { %4088 = vmatmul.mubr.msk.bf16.gmra.mrb[140].mxu0 %vm586_vm0, %v4283_v54 }
 0x12c   :  { %v3985_v1 = vpop.f32.mrb[36].mxu0 }
 0x12d   :  { %v994_v4 = vadd.f32 %v3985_v1, %v4862_v12  ;;  %v985_v5 = vpop.f32.mrb[37].mxu0 }
 0x12e   :  { %v986_v14 = vadd.f32 %v4862_v12, %v985_v5  ;;  %v3986_v15 = vpop.f32.mrb[38].mxu0 }
 0x12f   :  { %v1454_v7 = vmax.f32 %v994_v4, 0.0  ;;  %v997_v17 = vadd.f32 %v3986_v15, %v4862_v12  ;;  %v988_v9 = vpop.f32.mrb[39].mxu0 }
 0x130   :  { %v1452_v19 = vmax.f32 %v986_v14, 0.0  ;;  %v989_v20 = vadd.f32 %v4862_v12, %v988_v9  ;;  %v970_v14 = vadd.f32 %v4862_v12, %v4976_v57 }
 0x131   :  { %v1574_v23 = vmax.f32 %v1442_v6, %v1454_v7  ;;  %v1455_v24 = vmax.f32 %v997_v17, 0.0  ;;  %v981_v7 = vadd.f32 %v4981_v59, %v4862_v12 }
 0x132   :  { %v5012_v27 = vmax.f32 %v1440_v18, %v1452_v19  ;;  %v1453_v28 = vmax.f32 %v989_v20, 0.0  ;;  %v973_v19 = vadd.f32 %v4862_v12, %v4983_v60  ;;  %v1448_v25 = vmax.f32 %v970_v14, 0.0 }
 0x133   :  { %v1575_v31 = vmax.f32 %v1443_v22, %v1455_v24  ;;  %v1450_v22 = vmax.f32 %v978_v8, 0.0  ;;  %v1451_v29 = vmax.f32 %v981_v7, 0.0 }
 0x134   :  { %v5016_v33 = vmax.f32 %v1441_v26, %v1453_v28  ;;  %v3989_v34 = vpop.f32.mrb[40].mxu0  ;;  %v1449_v32 = vmax.f32 %v973_v19, 0.0 }
 0x135   :  { %v1010_v41 = vadd.f32 %v3989_v34, %v4862_v12  ;;  %v1001_v42 = vpop.f32.mrb[41].mxu0  ;;  %v5023_v45 = vmax.f32 %v1574_v23, %v1575_v31 }
 0x136   :  { %v1638_v47 = vmax.f32 %v5012_v27, %v5016_v33  ;;  %v1002_v50 = vadd.f32 %v4862_v12, %v1001_v42  ;;  %v3990_v52 = vpop.f32.mrb[42].mxu0 }
 0x137   :  { %v1458_v53 = vmax.f32 %v1010_v41, 0.0  ;;  %v1013_v54 = vadd.f32 %v3990_v52, %v4862_v12  ;;  %v1004_v56 = vpop.f32.mrb[43].mxu0 }
 0x138   :  { %v1456_v61 = vmax.f32 %v1002_v50, 0.0  ;;  %v1005_v62 = vadd.f32 %v4862_v12, %v1004_v56 }
 0x139   :  { %v1578_v0 = vmax.f32 %v1446_v49, %v1458_v53  ;;  %v1459_v1 = vmax.f32 %v1013_v54, 0.0 }
 0x13a   :  { %v1576_v4 = vmax.f32 %v1444_v58, %v1456_v61  ;;  %v1457_v5 = vmax.f32 %v1005_v62, 0.0  ;;  %v4155_v58 = vpack.i.bf16 %v4939_v37, %v4912_v10 }
 0x13b   :  { %v1579_v13 = vmax.f32 %v1447_v63, %v1459_v1 }
 0x13c   :  { %v1577_v15 = vmax.f32 %v1445_v3, %v1457_v5  ;;  %v3993_v6 = vpop.f32.mrb[44].mxu0 }
 0x13d   :  { %v1026_v17 = vadd.f32 %v3993_v6, %v4862_v12  ;;  %v1017_v9 = vpop.f32.mrb[45].mxu0  ;;  %v5048_v18 = vmax.f32 %v1578_v0, %v1579_v13 }
 0x13e   :  { %v1018_v55 = vadd.f32 %v4862_v12, %v1017_v9  ;;  %v3994_v20 = vpop.f32.mrb[46].mxu0  ;;  %v5053_v21 = vmax.f32 %v1576_v4, %v1577_v15 }
 0x13f   :  { %v1462_v57 = vmax.f32 %v1026_v17, 0.0  ;;  %v1029_v23 = vadd.f32 %v3994_v20, %v4862_v12  ;;  %v1020_v24 = vpop.f32.mrb[47].mxu0 }
 0x140   :  { %v1460_v59 = vmax.f32 %v1018_v55, 0.0  ;;  %v1021_v26 = vadd.f32 %v4862_v12, %v1020_v24  ;;  %v4140_v28 = vpack.i.bf16 %v5053_v21, %v5023_v45 }
 0x141   :  { %v5059_v31 = vmax.f32 %v1450_v22, %v1462_v57  ;;  %v1463_v60 = vmax.f32 %v1029_v23, 0.0 }
 0x142   :  { %v1580_v34 = vmax.f32 %v1448_v25, %v1460_v59  ;;  %v1461_v38 = vmax.f32 %v1021_v26, 0.0  ;;  %4141 = vrot.lane.b32.xlu0 %v4140_v28, %s4497_s27 }
 0x143   :  { %v5062_v39 = vmax.f32 %v1451_v29, %v1463_v60 }
 0x144   :  { %v1581_v41 = vmax.f32 %v1449_v32, %v1461_v38  ;;  %v3997_v42 = vpop.f32.mrb[48].mxu0 }
 0x145   :  { %v1643_v46 = vmax.f32 %v5059_v31, %v5062_v39  ;;  %v1033_v50 = vpop.f32.mrb[49].mxu0  ;;  %v1042_v3 = vadd.f32 %v3997_v42, %v4862_v12 }
 0x146   :  { %v3998_v52 = vpop.f32.mrb[50].mxu0  ;;  %4146 = vrot.lane.b32.xlu0 %v4145_v44, %s4497_s27  ;;  %v5069_v49 = vmax.f32 %v1580_v34, %v1581_v41  ;;  %v1034_v4 = vadd.f32 %v4862_v12, %v1033_v50 }
 0x147   :  { %v1036_v53 = vpop.f32.mrb[51].mxu0  ;;  %v1045_v8 = vadd.f32 %v3998_v52, %v4862_v12  ;;  %v1466_v30 = vmax.f32 %v1042_v3, 0.0 }
 0x148   :  { %v4150_v54 = vpack.i.bf16 %v5069_v49, %v5048_v18  ;;  %v1037_v15 = vadd.f32 %v4862_v12, %v1036_v53  ;;  %v1464_v9 = vmax.f32 %v1034_v4, 0.0 }
 0x149   :  { %v1467_v20 = vmax.f32 %v1045_v8, 0.0 }
 0x14a   :  { %4151 = vrot.lane.b32.xlu1 %v4150_v54, %s4497_s27  ;;  %v1465_v23 = vmax.f32 %v1037_v15, 0.0 }
 0x14c   :  { %v4001_v56 = vpop.f32.mrb[52].mxu0 }
 0x14d   :  { %v1049_v61 = vpop.f32.mrb[53].mxu0  ;;  %v1058_v59 = vadd.f32 %v4001_v56, %v4862_v12 }
 0x14e   :  { %v4002_v62 = vpop.f32.mrb[54].mxu0  ;;  %4156 = vrot.lane.b32.xlu1 %v4155_v58, %s4497_s27  ;;  %v1050_v28 = vadd.f32 %v4862_v12, %v1049_v61 }
 0x14f   :  { %v1052_v51 = vpop.f32.mrb[55].mxu0  ;;  %v1061_v60 = vadd.f32 %v4002_v62, %v4862_v12  ;;  %v1470_v50 = vmax.f32 %v1058_v59, 0.0 }
 0x150   :  { %v1053_v39 = vadd.f32 %v4862_v12, %v1052_v51  ;;  %v1468_v58 = vmax.f32 %v1050_v28, 0.0 }
 0x151   :  { %v1471_v3 = vmax.f32 %v1061_v60, 0.0 }
 0x152   :  { %1701 = vrot.lane.b32.xlu1 %v1637_v36, %s4497_s27 }
 0x154   :  { %v4005_v63 = vpop.f32.mrb[56].mxu0 }
 0x155   :  { %v1065_v0 = vpop.f32.mrb[57].mxu0 }
 0x156   :  { %v4006_v1 = vpop.f32.mrb[58].mxu0 }
 0x157   :  { %v1068_v2 = vpop.f32.mrb[59].mxu0 }
 0x15c   :  { %v4009_v5 = vpop.f32.mrb[60].mxu0 }
 0x15d   :  { %v1090_v13 = vadd.f32 %v4009_v5, %v4862_v12  ;;  %v1081_v14 = vpop.f32.mrb[61].mxu0  ;;  %v1469_v5 = vmax.f32 %v1053_v39, 0.0 }
 0x15e   :  { %v1082_v6 = vadd.f32 %v4862_v12, %v1081_v14  ;;  %v4010_v11 = vpop.f32.mrb[62].mxu0  ;;  %v1074_v14 = vadd.f32 %v4005_v63, %v4862_v12 }
 0x15f   :  { %v1478_v36 = vmax.f32 %v1090_v13, 0.0  ;;  %v1093_v7 = vadd.f32 %v4010_v11, %v4862_v12  ;;  %v1084_v17 = vpop.f32.mrb[63].mxu0 }
 0x160   :  { %v1476_v19 = vmax.f32 %v1082_v6, 0.0  ;;  %v1085_v55 = vadd.f32 %v4862_v12, %v1084_v17  ;;  %v1066_v6 = vadd.f32 %v4862_v12, %v1065_v0  ;;  %v1474_v63 = vmax.f32 %v1074_v14, 0.0 }
 0x161   :  { %v1586_v22 = vmax.f32 %v1466_v30, %v1478_v36  ;;  %v1479_v57 = vmax.f32 %v1093_v7, 0.0 }
 0x162   :  { %v5089_v24 = vmax.f32 %v1464_v9, %v1476_v19  ;;  %v1477_v25 = vmax.f32 %v1085_v55, 0.0  ;;  %v1069_v9 = vadd.f32 %v4862_v12, %v1068_v2 }
 0x163   :  { %v1587_v26 = vmax.f32 %v1467_v20, %v1479_v57 }
 0x164   :  { %v5093_v29 = vmax.f32 %v1465_v23, %v1477_v25  ;;  %v4013_v31 = vpop.f32.mrb[64].mxu0  ;;  %v1472_v23 = vmax.f32 %v1066_v6, 0.0 }
 0x165   :  { %v5096_v32 = vmax.f32 %v1586_v22, %v1587_v26  ;;  %v1106_v34 = vadd.f32 %v4013_v31, %v4862_v12  ;;  %v1097_v38 = vpop.f32.mrb[65].mxu0  ;;  %v1473_v31 = vmax.f32 %v1069_v9, 0.0 }
 0x166   :  { %v1644_v41 = vmax.f32 %v5089_v24, %v5093_v29  ;;  %v1098_v42 = vadd.f32 %v4862_v12, %v1097_v38  ;;  %v4014_v44 = vpop.f32.mrb[66].mxu0 }
 0x167   :  { %v1482_v52 = vmax.f32 %v1106_v34, 0.0  ;;  %v1109_v53 = vadd.f32 %v4014_v44, %v4862_v12  ;;  %v1100_v54 = vpop.f32.mrb[67].mxu0  ;;  %v4160_v56 = vpack.i.bf16 %v5096_v32, %v1643_v46  ;;  %v1077_v46 = vadd.f32 %v4006_v1, %v4862_v12 }
 0x168   :  { %v1480_v61 = vmax.f32 %v1098_v42, 0.0  ;;  %v1101_v62 = vadd.f32 %v4862_v12, %v1100_v54 }
 0x169   :  { %v1590_v4 = vmax.f32 %v1470_v50, %v1482_v52  ;;  %v1483_v51 = vmax.f32 %v1109_v53, 0.0  ;;  %4161 = vrot.lane.b32.xlu0 %v4160_v56, %s4497_s27  ;;  %v1475_v26 = vmax.f32 %v1077_v46, 0.0 }
 0x16a   :  { %v1588_v8 = vmax.f32 %v1468_v58, %v1480_v61  ;;  %v1481_v13 = vmax.f32 %v1101_v62, 0.0 }
 0x16b   :  { %v1591_v15 = vmax.f32 %v1471_v3, %v1483_v51 }
 0x16c   :  { %v1589_v11 = vmax.f32 %v1469_v5, %v1481_v13  ;;  %v4017_v30 = vpop.f32.mrb[68].mxu0 }
 0x16d   :  { %v5110_v36 = vmax.f32 %v1590_v4, %v1591_v15  ;;  %v1122_v7 = vadd.f32 %v4017_v30, %v4862_v12  ;;  %v1113_v17 = vpop.f32.mrb[69].mxu0 }
 0x16e   :  { %v5114_v19 = vmax.f32 %v1588_v8, %v1589_v11  ;;  %v1114_v55 = vadd.f32 %v4862_v12, %v1113_v17  ;;  %v4018_v20 = vpop.f32.mrb[70].mxu0 }
 0x16f   :  { %v1486_v22 = vmax.f32 %v1122_v7, 0.0  ;;  %v1125_v0 = vadd.f32 %v4018_v20, %v4862_v12  ;;  %v1116_v57 = vpop.f32.mrb[71].mxu0 }
 0x170   :  { %v1484_v25 = vmax.f32 %v1114_v55, 0.0  ;;  %v1117_v1 = vadd.f32 %v4862_v12, %v1116_v57  ;;  %v4165_v59 = vpack.i.bf16 %v5110_v36, %v5114_v19 }
 0x171   :  { %v1594_v28 = vmax.f32 %v1474_v63, %v1486_v22  ;;  %v1487_v2 = vmax.f32 %v1125_v0, 0.0 }
 0x172   :  { %v1592_v60 = vmax.f32 %v1472_v23, %v1484_v25  ;;  %v1485_v34 = vmax.f32 %v1117_v1, 0.0  ;;  %4166 = vrot.lane.b32.xlu0 %v4165_v59, %s4497_s27 }
 0x173   :  { %v1595_v38 = vmax.f32 %v1475_v26, %v1487_v2 }
 0x174   :  { %v1593_v39 = vmax.f32 %v1473_v31, %v1485_v34  ;;  %v4021_v42 = vpop.f32.mrb[72].mxu0 }
 0x175   :  { %v1649_v44 = vmax.f32 %v1594_v28, %v1595_v38  ;;  %v1129_v50 = vpop.f32.mrb[73].mxu0  ;;  %v1138_v13 = vadd.f32 %v4021_v42, %v4862_v12 }
 0x176   :  { %v5122_v52 = vmax.f32 %v1592_v60, %v1593_v39  ;;  %v4022_v53 = vpop.f32.mrb[74].mxu0  ;;  %v1130_v14 = vadd.f32 %v4862_v12, %v1129_v50 }
 0x177   :  { %v1132_v54 = vpop.f32.mrb[75].mxu0  ;;  %v1141_v6 = vadd.f32 %v4022_v53, %v4862_v12  ;;  %v1490_v9 = vmax.f32 %v1138_v13, 0.0 }
 0x178   :  { %v4170_v56 = vpack.i.bf16 %v1649_v44, %v5122_v52  ;;  %v1133_v46 = vadd.f32 %v4862_v12, %v1132_v54  ;;  %v1488_v22 = vmax.f32 %v1130_v14, 0.0 }
 0x179   :  { %v1491_v23 = vmax.f32 %v1141_v6, 0.0 }
 0x17a   :  { %4171 = vrot.lane.b32.xlu1 %v4170_v56, %s4497_s27  ;;  %v1489_v59 = vmax.f32 %v1133_v46, 0.0 }
 0x17c   :  { %v4025_v58 = vpop.f32.mrb[76].mxu0 }
 0x17d   :  { %v1145_v61 = vpop.f32.mrb[77].mxu0  ;;  %v1154_v2 = vadd.f32 %v4025_v58, %v4862_v12 }
 0x17e   :  { %v4026_v62 = vpop.f32.mrb[78].mxu0  ;;  %v1146_v60 = vadd.f32 %v4862_v12, %v1145_v61 }
 0x17f   :  { %v1148_v3 = vpop.f32.mrb[79].mxu0  ;;  %v1157_v39 = vadd.f32 %v4026_v62, %v4862_v12  ;;  %v1494_v13 = vmax.f32 %v1154_v2, 0.0 }
 0x180   :  { %v1149_v53 = vadd.f32 %v4862_v12, %v1148_v3  ;;  %v1492_v6 = vmax.f32 %v1146_v60, 0.0 }
 0x184   :  { %v4029_v4 = vpop.f32.mrb[80].mxu0 }
 0x185   :  { %v1161_v51 = vpop.f32.mrb[81].mxu0 }
 0x186   :  { %v4030_v5 = vpop.f32.mrb[82].mxu0 }
 0x187   :  { %v1164_v8 = vpop.f32.mrb[83].mxu0 }
 0x18c   :  { %v4033_v15 = vpop.f32.mrb[84].mxu0 }
 0x18d   :  { %v1186_v11 = vadd.f32 %v4033_v15, %v4862_v12  ;;  %v1177_v30 = vpop.f32.mrb[85].mxu0 }
 0x18e   :  { %v1178_v7 = vadd.f32 %v4862_v12, %v1177_v30  ;;  %v4034_v17 = vpop.f32.mrb[86].mxu0  ;;  %v1495_v30 = vmax.f32 %v1157_v39, 0.0 }
 0x18f   :  { %v1502_v55 = vmax.f32 %v1186_v11, 0.0  ;;  %v1189_v20 = vadd.f32 %v4034_v17, %v4862_v12  ;;  %v1180_v63 = vpop.f32.mrb[87].mxu0  ;;  %v1493_v17 = vmax.f32 %v1149_v53, 0.0 }
 0x190   :  { %v1500_v0 = vmax.f32 %v1178_v7, 0.0  ;;  %v1181_v57 = vadd.f32 %v4862_v12, %v1180_v63  ;;  %v1162_v63 = vadd.f32 %v4862_v12, %v1161_v51 }
 0x191   :  { %v1598_v25 = vmax.f32 %v1490_v9, %v1502_v55  ;;  %v1503_v1 = vmax.f32 %v1189_v20, 0.0  ;;  %v1170_v55 = vadd.f32 %v4029_v4, %v4862_v12 }
 0x192   :  { %v5134_v26 = vmax.f32 %v1488_v22, %v1500_v0  ;;  %v1501_v28 = vmax.f32 %v1181_v57, 0.0  ;;  %v1173_v57 = vadd.f32 %v4030_v5, %v4862_v12  ;;  %v1496_v39 = vmax.f32 %v1162_v63, 0.0 }
 0x193   :  { %v1599_v31 = vmax.f32 %v1491_v23, %v1503_v1  ;;  %v1498_v4 = vmax.f32 %v1170_v55, 0.0 }
 0x194   :  { %v5138_v34 = vmax.f32 %v1489_v59, %v1501_v28  ;;  %v4037_v38 = vpop.f32.mrb[88].mxu0  ;;  %v1165_v59 = vadd.f32 %v4862_v12, %v1164_v8  ;;  %v1499_v53 = vmax.f32 %v1173_v57, 0.0 }
 0x195   :  { %v5141_v42 = vmax.f32 %v1598_v25, %v1599_v31  ;;  %v1202_v44 = vadd.f32 %v4037_v38, %v4862_v12  ;;  %v1193_v50 = vpop.f32.mrb[89].mxu0 }
 0x196   :  { %v1650_v54 = vmax.f32 %v5134_v26, %v5138_v34  ;;  %v1194_v56 = vadd.f32 %v4862_v12, %v1193_v50  ;;  %v4038_v58 = vpop.f32.mrb[90].mxu0  ;;  %v4303_v26 = vld [vmem:[%s5923_s5 + $0x10] ss:$8 sps:$4 sm:$0xff]  }
 0x197   :  { %v1506_v61 = vmax.f32 %v1202_v44, 0.0  ;;  %v1205_v14 = vadd.f32 %v4038_v58, %v4862_v12  ;;  %v1196_v15 = vpop.f32.mrb[91].mxu0  ;;  %v1497_v58 = vmax.f32 %v1165_v59, 0.0 }
 0x198   :  { %v1504_v62 = vmax.f32 %v1194_v56, 0.0  ;;  %v1197_v11 = vadd.f32 %v4862_v12, %v1196_v15 }
 0x199   :  { %v1602_v46 = vmax.f32 %v1494_v13, %v1506_v61  ;;  %v1507_v7 = vmax.f32 %v1205_v14, 0.0 }
 0x19a   :  { %v1600_v3 = vmax.f32 %v1492_v6, %v1504_v62  ;;  %v1505_v9 = vmax.f32 %v1197_v11, 0.0 }
 0x19b   :  { %v1603_v20 = vmax.f32 %v1495_v30, %v1507_v7 }
 0x19c   :  { %v1601_v22 = vmax.f32 %v1493_v17, %v1505_v9  ;;  %v4041_v0 = vpop.f32.mrb[92].mxu0 }
 0x19d   :  { %v5153_v23 = vmax.f32 %v1602_v46, %v1603_v20  ;;  %v1218_v25 = vadd.f32 %v4041_v0, %v4862_v12  ;;  %v1209_v1 = vpop.f32.mrb[93].mxu0 }
 0x19e   :  { %v5157_v28 = vmax.f32 %v1600_v3, %v1601_v22  ;;  %v1210_v2 = vadd.f32 %v4862_v12, %v1209_v1  ;;  %v4042_v31 = vpop.f32.mrb[94].mxu0 }
 0x19f   :  { %v1510_v60 = vmax.f32 %v1218_v25, 0.0  ;;  %v1221_v51 = vadd.f32 %v4042_v31, %v4862_v12  ;;  %v1212_v38 = vpop.f32.mrb[95].mxu0 }
 0x1a0   :  { %v1508_v44 = vmax.f32 %v1210_v2, 0.0  ;;  %v1213_v5 = vadd.f32 %v4862_v12, %v1212_v38  ;;  %v4175_v50 = vpack.i.bf16 %v5157_v28, %v5141_v42 }
 0x1a1   :  { %v5164_v56 = vmax.f32 %v1498_v4, %v1510_v60  ;;  %v1511_v8 = vmax.f32 %v1221_v51, 0.0 }
 0x1a2   :  { %v1604_v13 = vmax.f32 %v1496_v39, %v1508_v44  ;;  %v1509_v61 = vmax.f32 %v1213_v5, 0.0  ;;  %4176 = vrot.lane.b32.xlu0 %v4175_v50, %s4497_s27 }
 0x1a3   :  { %v5167_v14 = vmax.f32 %v1499_v53, %v1511_v8 }
 0x1a4   :  { %v1605_v15 = vmax.f32 %v1497_v58, %v1509_v61  ;;  %v4045_v6 = vpop.f32.mrb[96].mxu0 }
 0x1a5   :  { %v1655_v62 = vmax.f32 %v5164_v56, %v5167_v14  ;;  %v1225_v11 = vpop.f32.mrb[97].mxu0  ;;  %v1234_v39 = vadd.f32 %v4045_v6, %v4862_v12 }
 0x1a6   :  { %v5171_v30 = vmax.f32 %v1604_v13, %v1605_v15  ;;  %v4046_v46 = vpop.f32.mrb[98].mxu0  ;;  %v1226_v44 = vadd.f32 %v4862_v12, %v1225_v11 }
 0x1a7   :  { %v1228_v7 = vpop.f32.mrb[99].mxu0  ;;  %v1514_v61 = vmax.f32 %v1234_v39, 0.0 }
 0x1a8   :  { %v4180_v17 = vpack.i.bf16 %v5171_v30, %v5153_v23  ;;  %v1512_v15 = vmax.f32 %v1226_v44, 0.0  ;;  %v1229_v6 = vadd.f32 %v4862_v12, %v1228_v7 }
 0x1aa   :  { %4181 = vrot.lane.b32.xlu1 %v4180_v17, %s4497_s27  ;;  %v1513_v44 = vmax.f32 %v1229_v6, 0.0 }
 0x1ac   :  { %v4049_v3 = vpop.f32.mrb[100].mxu0 }
 0x1ad   :  { %v1241_v9 = vpop.f32.mrb[101].mxu0 }
 0x1ae   :  { %v4050_v55 = vpop.f32.mrb[102].mxu0 }
 0x1af   :  { %v5176_v20 = vpop.f32.mrb[103].mxu0 }
 0x1b4   :  { %v5178_v63 = vpop.f32.mrb[104].mxu0  ;;  %v4142_v22 = vpop.permute.xlu0 %4141 }
 0x1b5   :  { %v4144_v0 = vunpack.i.h.bf16 %v4142_v22  ;;  %v4143_v57 = vunpack.i.l.bf16 %v4142_v22  ;;  %v5180_v25 = vpop.f32.mrb[105].mxu0 }
 0x1b6   :  { %v5182_v1 = vpop.f32.mrb[106].mxu0 }
 0x1b7   :  { %v5184_v59 = vpop.f32.mrb[107].mxu0  ;;  %v5190_v2 = vsel %vm1788_vm2, %v1638_v47, %v4143_v57  ;;  %v5194_v31 = vsel %vm1788_vm2, %v5023_v45, %v4144_v0  ;;  %v1237_v45 = vadd.f32 %v4046_v46, %v4862_v12 }
 0x1b8   :  { %v4147_v4 = vpop.permute.xlu0 %4146  ;;  %v1820_v60 = vpack.c.bf16 %v5194_v31, %v5190_v2 }
 0x1b9   :  { %v4149_v51 = vunpack.i.h.bf16 %v4147_v4  ;;  %v4148_v38 = vunpack.i.l.bf16 %v4147_v4  ;;  %v1515_v22 = vmax.f32 %v1237_v45, 0.0 }
 0x1ba   :  { %2012 = vmatprep.mubr.bf16.mxu1 %v1820_v60 }
 0x1bb   :  { %v1789_v27 = vsel %vm1788_vm2, %v1632_v48, %v4148_v38  ;;  %v1790_v33 = vsel %vm1788_vm2, %v4889_v43, %v4149_v51 }
 0x1bc   :  { %v4057_v47 = vpop.f32.mrb[108].mxu0  ;;  %v4152_v5 = vpop.permute.xlu1 %4151  ;;  %v1819_v50 = vpack.c.bf16 %v1790_v33, %v1789_v27 }
 0x1bd   :  { %v1282_v53 = vadd.f32 %v4057_v47, %v4862_v12  ;;  %v4154_v8 = vunpack.i.h.bf16 %v4152_v5  ;;  %v4153_v58 = vunpack.i.l.bf16 %v4152_v5  ;;  %v1273_v13 = vpop.f32.mrb[109].mxu0 }
 0x1be   :  { %v1274_v35 = vadd.f32 %v4862_v12, %v1273_v13  ;;  %v4058_v40 = vpop.f32.mrb[110].mxu0  ;;  %2013 = vmatmul.mubr.bf16.vlgmr.msra.gmra.mrb[0].mxu1 %v1819_v50 }
 0x1bf   :  { %v1526_v48 = vmax.f32 %v1282_v53, 0.0  ;;  %v1285_v43 = vadd.f32 %v4058_v40, %v4862_v12  ;;  %v1276_v11 = vpop.f32.mrb[111].mxu0  ;;  %v5213_v46 = vsel %vm1788_vm2, %v5053_v21, %v4153_v58  ;;  %v5217_v17 = vsel %vm1788_vm2, %v5048_v18, %v4154_v8  ;;  %v5227_v18 = vld [vmem:[%s5949_s21] ss:$0 sm:$0xff] }
 0x1c0   :  { %v1524_v0 = vmax.f32 %v1274_v35, 0.0  ;;  %v1277_v7 = vadd.f32 %v4862_v12, %v1276_v11  ;;  %v4157_v57 = vpop.permute.xlu1 %4156  ;;  %v1822_v4 = vpack.c.bf16 %v5217_v17, %v5213_v46  ;;  %v1250_v12 = vadd.f32 %v5227_v18, %v4049_v3 }
 0x1c1   :  { %v1610_v60 = vmax.f32 %v1514_v61, %v1526_v48  ;;  %v1527_v51 = vmax.f32 %v1285_v43, 0.0  ;;  %v4159_v38 = vunpack.i.h.bf16 %v4157_v57  ;;  %v4158_v39 = vunpack.i.l.bf16 %v4157_v57 }
 0x1c2   :  { %v5222_v27 = vmax.f32 %v1512_v15, %v1524_v0  ;;  %v1525_v21 = vmax.f32 %v1277_v7, 0.0  ;;  %2020 = vmatprep.mubr.bf16.mxu1 %v1822_v4  ;;  %v1242_v5 = vadd.f32 %v5227_v18, %v1241_v9  ;;  %v1253_v58 = vadd.f32 %v5227_v18, %v4050_v55 }
 0x1c3   :  { %v1611_v33 = vmax.f32 %v1515_v22, %v1527_v51  ;;  %v1791_v45 = vsel %vm1788_vm2, %v4920_v16, %v4158_v39  ;;  %v1792_v47 = vsel %vm1788_vm2, %v4912_v10, %v4159_v38  ;;  %v1245_v15 = vadd.f32 %v5227_v18, %v5176_v20 }
 0x1c4   :  { %v5235_v50 = vmax.f32 %v1513_v44, %v1525_v21  ;;  %v4061_v53 = vpop.f32.mrb[112].mxu0  ;;  %v1821_v8 = vpack.c.bf16 %v1792_v47, %v1791_v45  ;;  %v1518_v6 = vmax.f32 %v1250_v12, 0.0  ;;  %v1516_v43 = vmax.f32 %v1242_v5, 0.0 }
 0x1c5   :  { %v5238_v13 = vmax.f32 %v1610_v60, %v1611_v33  ;;  %v1298_v61 = vadd.f32 %v5227_v18, %v4061_v53  ;;  %v1289_v3 = vpop.f32.mrb[113].mxu0  ;;  %v1519_v22 = vmax.f32 %v1253_v58, 0.0  ;;  %v1517_v57 = vmax.f32 %v1245_v15, 0.0 }
 0x1c6   :  { %v1656_v16 = vmax.f32 %v5222_v27, %v5235_v50  ;;  %v1290_v10 = vadd.f32 %v5227_v18, %v1289_v3  ;;  %v4062_v9 = vpop.f32.mrb[114].mxu0  ;;  %2021 = vmatmul.mubr.bf16.gmra.mrb[4].mxu1 %v1821_v8  ;;  %v1266_v51 = vadd.f32 %v5227_v18, %v5178_v63  ;;  %v1258_v56 = vadd.f32 %v5227_v18, %v5180_v25  ;;  %v4336_v50 = vld [vmem:[%s5923_s5 + $0xc0] ss:$8 sps:$4 sm:$0xff]  }
 0x1c7   :  { %v1530_v35 = vmax.f32 %v1298_v61, 0.0  ;;  %v1301_v40 = vadd.f32 %v5227_v18, %v4062_v9  ;;  %v1292_v55 = vpop.f32.mrb[115].mxu0  ;;  %v4185_v48 = vpack.i.bf16 %v5238_v13, %v1655_v62  ;;  %v1269_v39 = vadd.f32 %v5227_v18, %v5182_v1 }
 0x1c8   :  { %v1528_v11 = vmax.f32 %v1290_v10, 0.0  ;;  %v1293_v20 = vadd.f32 %v5227_v18, %v1292_v55  ;;  %v1261_v33 = vadd.f32 %v5227_v18, %v5184_v59  ;;  %v1522_v5 = vmax.f32 %v1266_v51, 0.0 }
 0x1c9   :  { %v1614_v0 = vmax.f32 %v1518_v6, %v1530_v35  ;;  %v1531_v7 = vmax.f32 %v1301_v40, 0.0  ;;  %4186 = vrot.lane.b32.xlu0 %v4185_v48, %s4497_s27  ;;  %v1520_v58 = vmax.f32 %v1258_v56, 0.0  ;;  %v1523_v15 = vmax.f32 %v1269_v39, 0.0 }
 0x1ca   :  { %v1612_v4 = vmax.f32 %v1516_v43, %v1528_v11  ;;  %v1529_v60 = vmax.f32 %v1293_v20, 0.0  ;;  %v1521_v9 = vmax.f32 %v1261_v33, 0.0 }
 0x1cb   :  { %v1615_v38 = vmax.f32 %v1519_v22, %v1531_v7 }
 0x1cc   :  { %v1613_v14 = vmax.f32 %v1517_v57, %v1529_v60  ;;  %v4065_v62 = vpop.f32.mrb[116].mxu0  ;;  %v1702_v57 = vpop.permute.xlu1 %1701 }
 0x1cd   :  { %v5259_v44 = vmax.f32 %v1614_v0, %v1615_v38  ;;  %v1314_v21 = vadd.f32 %v5227_v18, %v4065_v62  ;;  %v1305_v12 = vpop.f32.mrb[117].mxu0  ;;  %v1793_v56 = vsel %vm1788_vm2, %v4939_v37, %v1702_v57 }
 0x1ce   :  { %v5264_v45 = vmax.f32 %v1612_v4, %v1613_v14  ;;  %v1306_v63 = vadd.f32 %v5227_v18, %v1305_v12  ;;  %v4066_v47 = vpop.f32.mrb[118].mxu0 }
 0x1cf   :  { %v1534_v25 = vmax.f32 %v1314_v21, 0.0  ;;  %v1317_v53 = vadd.f32 %v5227_v18, %v4066_v47  ;;  %v1308_v8 = vpop.f32.mrb[119].mxu0 }
 0x1d0   :  { %v1532_v1 = vmax.f32 %v1306_v63, 0.0  ;;  %v1309_v61 = vadd.f32 %v5227_v18, %v1308_v8  ;;  %v4190_v3 = vpack.i.bf16 %v5259_v44, %v5264_v45  ;;  %v1823_v63 = vpack.c.bf16 %v5190_v2, %v1793_v56 }
 0x1d1   :  { %v1618_v10 = vmax.f32 %v1522_v5, %v1534_v25  ;;  %v1535_v59 = vmax.f32 %v1317_v53, 0.0 }
 0x1d2   :  { %v1616_v6 = vmax.f32 %v1520_v58, %v1532_v1  ;;  %v1533_v35 = vmax.f32 %v1309_v61, 0.0  ;;  %4191 = vrot.lane.b32.xlu1 %v4190_v3, %s4497_s27  ;;  %v1825_v58 = vpack.c.bf16 %v5213_v46, %v5194_v31 }
 0x1d3   :  { %v1619_v40 = vmax.f32 %v1523_v15, %v1535_v59 }
 0x1d4   :  { %v1617_v55 = vmax.f32 %v1521_v9, %v1533_v35  ;;  %v4069_v48 = vpop.f32.mrb[120].mxu0 }
 0x1d5   :  { %v1661_v43 = vmax.f32 %v1618_v10, %v1619_v40  ;;  %v1321_v11 = vpop.f32.mrb[121].mxu0  ;;  %v1330_v8 = vadd.f32 %v5227_v18, %v4069_v48 }
 0x1d6   :  { %v5272_v20 = vmax.f32 %v1616_v6, %v1617_v55  ;;  %v4070_v22 = vpop.f32.mrb[122].mxu0  ;;  %v1322_v1 = vadd.f32 %v5227_v18, %v1321_v11 }
 0x1d7   :  { %v1324_v0 = vpop.f32.mrb[123].mxu0  ;;  %v1333_v61 = vadd.f32 %v5227_v18, %v4070_v22  ;;  %v1538_v15 = vmax.f32 %v1330_v8, 0.0 }
 0x1d8   :  { %v4195_v7 = vpack.i.bf16 %v1661_v43, %v5272_v20  ;;  %v1536_v35 = vmax.f32 %v1322_v1, 0.0 }
 0x1d9   :  { %v1539_v40 = vmax.f32 %v1333_v61, 0.0 }
 0x1da   :  { %4196 = vrot.lane.b32.xlu0 %v4195_v7, %s4497_s27 }
 0x1db   :  { %v4162_v4 = vpop.permute.xlu0 %4161 }
 0x1dc   :  { %v4164_v60 = vunpack.i.h.bf16 %v4162_v4  ;;  %v4163_v51 = vunpack.i.l.bf16 %v4162_v4  ;;  %v4073_v38 = vpop.f32.mrb[124].mxu0 }
 0x1dd   :  { %v1337_v14 = vpop.f32.mrb[125].mxu0 }
 0x1de   :  { %v1798_v62 = vsel %vm1788_vm2, %v5069_v49, %v4163_v51  ;;  %v5284_v39 = vsel %vm1788_vm2, %v1644_v41, %v4164_v60  ;;  %v4074_v21 = vpop.f32.mrb[126].mxu0  ;;  %v1346_v60 = vadd.f32 %v5227_v18, %v4073_v38 }
 0x1df   :  { %v1824_v12 = vpack.c.bf16 %v5284_v39, %v1798_v62  ;;  %v1340_v33 = vpop.f32.mrb[127].mxu0 }
 0x1e0   :  { %v1542_v38 = vmax.f32 %v1346_v60, 0.0 }
 0x1e1   :  { %2028 = vmatprep.mubr.bf16.mxu1 %v1824_v12  ;;  %v1827_v12 = vpack.c.bf16 %v1798_v62, %v5217_v17 }
 0x1e2   :  { %2029 = vmatmul.mubr.bf16.gmra.mrb[8].mxu1 %v1823_v63 }
 0x1e4   :  { %v4167_v47 = vpop.permute.xlu0 %4166  ;;  %v5288_v37 = vpop.f32.mrb[128].mxu0 }
 0x1e5   :  { %v4169_v5 = vunpack.i.h.bf16 %v4167_v47  ;;  %v4168_v25 = vunpack.i.l.bf16 %v4167_v47  ;;  %v5290_v49 = vpop.f32.mrb[129].mxu0  ;;  %v1349_v47 = vadd.f32 %v5227_v18, %v4074_v21 }
 0x1e6   :  { %v5292_v53 = vpop.f32.mrb[130].mxu0 }
 0x1e7   :  { %v5296_v24 = vsel %vm1788_vm2, %v5096_v32, %v4168_v25  ;;  %v5300_v29 = vsel %vm1788_vm2, %v5114_v19, %v4169_v5  ;;  %v5302_v41 = vpop.f32.mrb[131].mxu0  ;;  %v1325_v32 = vadd.f32 %v5227_v18, %v1324_v0  ;;  %v1341_v25 = vadd.f32 %v5227_v18, %v1340_v33 }
 0x1e8   :  { %v1826_v2 = vpack.c.bf16 %v5300_v29, %v5296_v24  ;;  %v1829_v34 = vpack.c.bf16 %v5296_v24, %v5284_v39 }
 0x1e9   :  { %v1537_v0 = vmax.f32 %v1325_v32, 0.0  ;;  %v1543_v32 = vmax.f32 %v1349_v47, 0.0 }
 0x1ea   :  { %2035 = vmatprep.mubr.bf16.mxu1 %v1826_v2 }
 0x1eb   :  { %2036 = vmatmul.mubr.bf16.gmra.mrb[12].mxu1 %v1825_v58 }
 0x1ec   :  { %v4172_v19 = vpop.permute.xlu1 %4171  ;;  %v4081_v3 = vpop.f32.mrb[132].mxu0 }
 0x1ed   :  { %v4174_v10 = vunpack.i.h.bf16 %v4172_v19  ;;  %v4173_v59 = vunpack.i.l.bf16 %v4172_v19  ;;  %v1378_v9 = vadd.f32 %v5227_v18, %v4081_v3  ;;  %v1369_v6 = vpop.f32.mrb[133].mxu0 }
 0x1ee   :  { %v1370_v31 = vadd.f32 %v5227_v18, %v1369_v6  ;;  %v4082_v46 = vpop.f32.mrb[134].mxu0 }
 0x1ef   :  { %v1550_v55 = vmax.f32 %v1378_v9, 0.0  ;;  %v1381_v48 = vadd.f32 %v5227_v18, %v4082_v46  ;;  %v5317_v43 = vsel %vm1788_vm2, %v5110_v36, %v4173_v59  ;;  %v5321_v11 = vsel %vm1788_vm2, %v5122_v52, %v4174_v10  ;;  %v1372_v22 = vpop.f32.mrb[135].mxu0 }
 0x1f0   :  { %v1548_v7 = vmax.f32 %v1370_v31, 0.0  ;;  %v1828_v57 = vpack.c.bf16 %v5321_v11, %v5317_v43  ;;  %v1373_v4 = vadd.f32 %v5227_v18, %v1372_v22  ;;  %v1338_v36 = vadd.f32 %v5227_v18, %v1337_v14 }
 0x1f1   :  { %v1622_v51 = vmax.f32 %v1538_v15, %v1550_v55  ;;  %v1551_v56 = vmax.f32 %v1381_v48, 0.0  ;;  %v1541_v15 = vmax.f32 %v1341_v25, 0.0  ;;  %v1362_v9 = vadd.f32 %v5227_v18, %v5288_v37 }
 0x1f2   :  { %v5329_v63 = vmax.f32 %v1536_v35, %v1548_v7  ;;  %2043 = vmatprep.mubr.bf16.mxu1 %v1828_v57  ;;  %v1549_v52 = vmax.f32 %v1373_v4, 0.0  ;;  %v1540_v14 = vmax.f32 %v1338_v36, 0.0  ;;  %v1365_v55 = vadd.f32 %v5227_v18, %v5292_v53 }
 0x1f3   :  { %v1623_v5 = vmax.f32 %v1539_v40, %v1551_v56  ;;  %2044 = vmatmul.mubr.bf16.gmra.mrb[16].mxu1 %v1827_v12  ;;  %v1354_v40 = vadd.f32 %v5227_v18, %v5290_v49  ;;  %v1357_v22 = vadd.f32 %v5227_v18, %v5302_v41  ;;  %v1546_v57 = vmax.f32 %v1362_v9, 0.0 }
 0x1f4   :  { %v5333_v2 = vmax.f32 %v1537_v0, %v1549_v52  ;;  %v4085_v8 = vpop.f32.mrb[136].mxu0  ;;  %v1547_v36 = vmax.f32 %v1365_v55, 0.0 }
 0x1f5   :  { %v5335_v58 = vmax.f32 %v1622_v51, %v1623_v5  ;;  %v1394_v17 = vadd.f32 %v5227_v18, %v4085_v8  ;;  %v1385_v62 = vpop.f32.mrb[137].mxu0  ;;  %v1544_v51 = vmax.f32 %v1354_v40, 0.0  ;;  %v1545_v41 = vmax.f32 %v1357_v22, 0.0 }
 0x1f6   :  { %v1662_v1 = vmax.f32 %v5329_v63, %v5333_v2  ;;  %v1386_v61 = vadd.f32 %v5227_v18, %v1385_v62  ;;  %v4086_v21 = vpop.f32.mrb[138].mxu0 }
 0x1f7   :  { %v1554_v19 = vmax.f32 %v1394_v17, 0.0  ;;  %v1397_v33 = vadd.f32 %v5227_v18, %v4086_v21  ;;  %v1388_v3 = vpop.f32.mrb[139].mxu0 }
 0x1f8   :  { %v1552_v10 = vmax.f32 %v1386_v61, 0.0  ;;  %v1389_v59 = vadd.f32 %v5227_v18, %v1388_v3  ;;  %v4302_v3 = vld [vmem:[%s5923_s5 + $0x4] ss:$8 sps:$4 sm:$0xff]  }
 0x1f9   :  { %v1626_v6 = vmax.f32 %v1542_v38, %v1554_v19  ;;  %v1555_v35 = vmax.f32 %v1397_v33, 0.0  ;;  %2535 = vmatprep.subr.bf16.mxu1 %v4302_v3  ;;  %v4339_v3 = vld [vmem:[%s5923_s5 + $0xd0] ss:$8 sps:$4 sm:$0xff]  }
 0x1fa   :  { %v1624_v31 = vmax.f32 %v1540_v14, %v1552_v10  ;;  %v1553_v46 = vmax.f32 %v1389_v59, 0.0 }
 0x1fb   :  { %v1627_v48 = vmax.f32 %v1543_v32, %v1555_v35  ;;  %v4305_v35 = vld [vmem:[%s5923_s5 + $0x14] ss:$8 sps:$4 sm:$0xff]  }
 0x1fc   :  { %v1625_v0 = vmax.f32 %v1541_v15, %v1553_v46  ;;  %v4089_v7 = vpop.f32.mrb[140].mxu0 }
 0x1fd   :  { %v5351_v4 = vmax.f32 %v1626_v6, %v1627_v48  ;;  %v1410_v37 = vadd.f32 %v5227_v18, %v4089_v7  ;;  %v1401_v60 = vpop.f32.mrb[141].mxu0  ;;  %v4311_v48 = vld [vmem:[%s5923_s5 + $0x34] ss:$8 sps:$4 sm:$0xff]   ;;  %v1831_v7 = vpack.c.bf16 %v5317_v43, %v5300_v29  ;;  %v4315_v29 = vld [vmem:[%s5923_s5 + $0x50] ss:$8 sps:$4 sm:$0xff]  }
 0x1fe   :  { %v5354_v56 = vmax.f32 %v1624_v31, %v1625_v0  ;;  %v1402_v49 = vadd.f32 %v5227_v18, %v1401_v60  ;;  %v4090_v12 = vpop.f32.mrb[142].mxu0  ;;  %v4309_v0 = vld [vmem:[%s5923_s5 + $0x30] ss:$8 sps:$4 sm:$0xff]   ;;  %v4320_v43 = vld [vmem:[%s5923_s5 + $0x64] ss:$8 sps:$4 sm:$0xff]  }
 0x1ff   :  { %v1558_v53 = vmax.f32 %v1410_v37, 0.0  ;;  %v1413_v52 = vadd.f32 %v5227_v18, %v4090_v12  ;;  %v1404_v47 = vpop.f32.mrb[143].mxu0  ;;  %v4318_v37 = vld [vmem:[%s5923_s5 + $0x60] ss:$8 sps:$4 sm:$0xff]   ;;  %v4323_v60 = vld [vmem:[%s5923_s5 + $0x74] ss:$8 sps:$4 sm:$0xff]  }
 0x200   :  { %v1556_v5 = vmax.f32 %v1402_v49, 0.0  ;;  %v1405_v25 = vadd.f32 %v5227_v18, %v1404_v47  ;;  %v4200_v8 = vpack.i.bf16 %v5354_v56, %v5335_v58  ;;  %v4300_v18 = vld [vmem:[%s5923_s5] ss:$8 sps:$4 sm:$0xff]   ;;  %v4326_v49 = vld [vmem:[%s5923_s5 + $0x84] ss:$8 sps:$4 sm:$0xff]  }
 0x201   :  { %v1630_v38 = vmax.f32 %v1546_v57, %v1558_v53  ;;  %v1559_v17 = vmax.f32 %v1413_v52, 0.0  ;;  %2536 = vmatpush1.bf16.msra.mxu1 %v4300_v18  ;;  %v4317_v57 = vld [vmem:[%s5923_s5 + $0x54] ss:$8 sps:$4 sm:$0xff]   ;;  %v4324_v12 = vld [vmem:[%s5923_s5 + $0x80] ss:$8 sps:$4 sm:$0xff]  }
 0x202   :  { %v1628_v62 = vmax.f32 %v1544_v51, %v1556_v5  ;;  %v1557_v14 = vmax.f32 %v1405_v25, 0.0  ;;  %4201 = vrot.lane.b32.xlu1 %v4200_v8, %s4497_s27  ;;  %2537 = vmatprep.subr.bf16.mxu1 %v4305_v35  ;;  %v4321_v51 = vld [vmem:[%s5923_s5 + $0x70] ss:$8 sps:$4 sm:$0xff]   ;;  %v4332_v47 = vld [vmem:[%s5923_s5 + $0xa4] ss:$8 sps:$4 sm:$0xff]  }
 0x203   :  { %v1631_v61 = vmax.f32 %v1547_v36, %v1559_v17  ;;  %v4329_v36 = vld [vmem:[%s5923_s5 + $0x94] ss:$8 sps:$4 sm:$0xff]   ;;  %v4327_v53 = vld [vmem:[%s5923_s5 + $0x90] ss:$8 sps:$4 sm:$0xff]   ;;  %v4330_v25 = vld [vmem:[%s5923_s5 + $0xa0] ss:$8 sps:$4 sm:$0xff]  }
 0x204   :  { %v1629_v21 = vmax.f32 %v1545_v41, %v1557_v14  ;;  %v4333_v14 = vld [vmem:[%s5923_s5 + $0xb0] ss:$8 sps:$4 sm:$0xff]  }
 0x205   :  { %v1667_v32 = vmax.f32 %v1630_v38, %v1631_v61  ;;  %2538 = vmatpush1.bf16.msra.mxu1 %v4303_v26  ;;  %v4345_v26 = vld [vmem:[%s5923_s5 + $0xf0] ss:$8 sps:$4 sm:$0xff]  }
 0x206   :  { %v5362_v19 = vmax.f32 %v1628_v62, %v1629_v21  ;;  %v4335_v62 = vld [vmem:[%s5923_s5 + $0xb4] ss:$8 sps:$4 sm:$0xff]  }
 0x207   :  { %1781 = vrot.lane.b32.xlu1 %v1667_v32, %s4497_s27 }
 0x208   :  { %v4205_v33 = vpack.i.bf16 %v5362_v19, %v5351_v4 }
 0x20a   :  { %4206 = vrot.lane.b32.xlu0 %v4205_v33, %s4497_s27  ;;  %v4341_v33 = vld [vmem:[%s5923_s5 + $0xd4] ss:$8 sps:$4 sm:$0xff]  }
 0x214   :  { %v4177_v15 = vpop.permute.xlu0 %4176 }
 0x215   :  { %v4179_v10 = vunpack.i.h.bf16 %v4177_v15  ;;  %v4178_v59 = vunpack.i.l.bf16 %v4177_v15 }
 0x217   :  { %v5378_v9 = vsel %vm1788_vm2, %v1650_v54, %v4178_v59  ;;  %v5382_v6 = vsel %vm1788_vm2, %v5141_v42, %v4179_v10  ;;  %v4308_v42 = vld [vmem:[%s5923_s5 + $0x24] ss:$8 sps:$4 sm:$0xff]   ;;  %v4342_v10 = vld [vmem:[%s5923_s5 + $0xe0] ss:$8 sps:$4 sm:$0xff]  }
 0x218   :  { %v1830_v40 = vpack.c.bf16 %v5382_v6, %v5378_v9  ;;  %v1833_v31 = vpack.c.bf16 %v5378_v9, %v5321_v11  ;;  %v4306_v11 = vld [vmem:[%s5923_s5 + $0x20] ss:$8 sps:$4 sm:$0xff]   ;;  %2539 = vmatprep.subr.bf16.mxu1 %v4308_v42  ;;  %v4350_v42 = vld [vmem:[%s5923_s5 + $0x104] ss:$8 sps:$4 sm:$0xff]  }
 0x219   :  { %2540 = vmatpush1.bf16.msra.mxu1 %v4306_v11 }
 0x21a   :  { %2050 = vmatprep.mubr.bf16.mxu1 %v1830_v40  ;;  %2541 = vmatprep.subr.bf16.mxu1 %v4311_v48 }
 0x21b   :  { %2051 = vmatmul.mubr.bf16.gmra.mrb[20].mxu1 %v1829_v34 }
 0x21c   :  { %v4182_v54 = vpop.permute.xlu1 %4181 }
 0x21d   :  { %v4184_v46 = vunpack.i.h.bf16 %v4182_v54  ;;  %v4183_v55 = vunpack.i.l.bf16 %v4182_v54  ;;  %2542 = vmatpush1.bf16.msra.mxu1 %v4309_v0 }
 0x21f   :  { %v5404_v39 = vsel %vm1788_vm2, %v5157_v28, %v4183_v55  ;;  %v5408_v24 = vsel %vm1788_vm2, %v5153_v23, %v4184_v46  ;;  %v4314_v23 = vld [vmem:[%s5923_s5 + $0x44] ss:$8 sps:$4 sm:$0xff]   ;;  %v4312_v28 = vld [vmem:[%s5923_s5 + $0x40] ss:$8 sps:$4 sm:$0xff]  }
 0x220   :  { %v1832_v22 = vpack.c.bf16 %v5408_v24, %v5404_v39  ;;  %2543 = vmatprep.subr.bf16.mxu1 %v4314_v23  ;;  %v1835_v15 = vpack.c.bf16 %v5404_v39, %v5382_v6  ;;  %v4347_v6 = vld [vmem:[%s5923_s5 + $0xf4] ss:$8 sps:$4 sm:$0xff]  }
 0x221   :  { %2544 = vmatpush1.bf16.msra.mxu1 %v4312_v28 }
 0x222   :  { %2058 = vmatprep.mubr.bf16.mxu1 %v1832_v22  ;;  %2545 = vmatprep.subr.bf16.mxu1 %v4317_v57 }
 0x223   :  { %2059 = vmatmul.mubr.bf16.gmra.mrb[24].mxu1 %v1831_v7 }
 0x225   :  { %2546 = vmatpush1.bf16.msra.mxu1 %v4315_v29 }
 0x226   :  { %2547 = vmatprep.subr.bf16.mxu1 %v4320_v43 }
 0x229   :  { %2548 = vmatpush1.bf16.msra.mxu1 %v4318_v37 }
 0x22a   :  { %2549 = vmatprep.subr.bf16.mxu1 %v4323_v60 }
 0x22d   :  { %2550 = vmatpush1.bf16.msra.mxu1 %v4321_v51 }
 0x22e   :  { %2551 = vmatprep.subr.bf16.mxu1 %v4326_v49 }
 0x231   :  { %2552 = vmatpush1.bf16.msra.mxu1 %v4324_v12 }
 0x232   :  { %2553 = vmatprep.subr.bf16.mxu1 %v4329_v36 }
 0x235   :  { %2554 = vmatpush1.bf16.msra.mxu1 %v4327_v53 }
 0x236   :  { %2555 = vmatprep.subr.bf16.mxu1 %v4332_v47 }
 0x239   :  { %2556 = vmatpush1.bf16.msra.mxu1 %v4330_v25 }
 0x23a   :  { %2557 = vmatprep.subr.bf16.mxu1 %v4335_v62 }
 0x23b   :  { %v4187_v52 = vpop.permute.xlu0 %4186 }
 0x23c   :  { %v4189_v41 = vunpack.i.h.bf16 %v4187_v52  ;;  %v4188_v5 = vunpack.i.l.bf16 %v4187_v52  ;;  %v5527_v52 = vld [vmem:[%s5924_s4] ss:$0 sm:$0xff] }
 0x23d   :  { %2558 = vmatpush1.bf16.msra.mxu1 %v4333_v14 }
 0x23e   :  { %v1808_v8 = vsel %vm1788_vm2, %v5171_v30, %v4188_v5  ;;  %v1809_v38 = vsel %vm1788_vm2, %v1656_v16, %v4189_v41  ;;  %v4338_v30 = vld [vmem:[%s5923_s5 + $0xc4] ss:$8 sps:$4 sm:$0xff]  }
 0x23f   :  { %v1834_v17 = vpack.c.bf16 %v1809_v38, %v1808_v8  ;;  %2559 = vmatprep.subr.bf16.mxu1 %v4338_v30  ;;  %v1837_v34 = vpack.c.bf16 %v1808_v8, %v5408_v24 }
 0x241   :  { %2066 = vmatprep.mubr.bf16.mxu1 %v1834_v17  ;;  %2560 = vmatpush1.bf16.msra.mxu1 %v4336_v50 }
 0x242   :  { %2067 = vmatmul.mubr.bf16.gmra.mrb[28].mxu1 %v1833_v31  ;;  %2561 = vmatprep.subr.bf16.mxu1 %v4341_v33 }
 0x244   :  { %v4192_v27 = vpop.permute.xlu1 %4191 }
 0x245   :  { %v4194_v16 = vunpack.i.h.bf16 %v4192_v27  ;;  %v4193_v61 = vunpack.i.l.bf16 %v4192_v27  ;;  %2562 = vmatpush1.bf16.msra.mxu1 %v4339_v3 }
 0x247   :  { %v1810_v21 = vsel %vm1788_vm2, %v5238_v13, %v4193_v61  ;;  %v1811_v32 = vsel %vm1788_vm2, %v5264_v45, %v4194_v16  ;;  %v4344_v13 = vld [vmem:[%s5923_s5 + $0xe4] ss:$8 sps:$4 sm:$0xff]  }
 0x248   :  { %v1836_v18 = vpack.c.bf16 %v1811_v32, %v1810_v21  ;;  %2563 = vmatprep.subr.bf16.mxu1 %v4344_v13  ;;  %v1839_v39 = vpack.c.bf16 %v1810_v21, %v1809_v38 }
 0x249   :  { %2564 = vmatpush1.bf16.msra.mxu1 %v4342_v10 }
 0x24a   :  { %2073 = vmatprep.mubr.bf16.mxu1 %v1836_v18  ;;  %2565 = vmatprep.subr.bf16.mxu1 %v4347_v6 }
 0x24b   :  { %2074 = vmatmul.mubr.bf16.gmra.mrb[32].mxu1 %v1835_v15 }
 0x24c   :  { %v4197_v45 = vpop.permute.xlu0 %4196 }
 0x24d   :  { %v4199_v59 = vunpack.i.h.bf16 %v4197_v45  ;;  %v4198_v9 = vunpack.i.l.bf16 %v4197_v45  ;;  %2566 = vmatpush1.bf16.msra.mxu1 %v4345_v26 }
 0x24e   :  { %2576 = vmatprep.subr.bf16.mxu1 %v4350_v42 }
 0x24f   :  { %v1812_v35 = vsel %vm1788_vm2, %v5259_v44, %v4198_v9  ;;  %v1813_v40 = vsel %vm1788_vm2, %v5272_v20, %v4199_v59 }
 0x250   :  { %v1838_v31 = vpack.c.bf16 %v1813_v40, %v1812_v35  ;;  %v1843_v28 = vpack.c.bf16 %v1813_v40, %v1813_v40 }
 0x252   :  { %2081 = vmatprep.mubr.bf16.mxu1 %v1838_v31 }
 0x253   :  { %2082 = vmatmul.mubr.bf16.gmra.mrb[36].mxu1 %v1837_v34 }
 0x274   :  { %v4202_v44 = vpop.permute.xlu1 %4201 }
 0x275   :  { %v4204_v54 = vunpack.i.h.bf16 %v4202_v44  ;;  %v4203_v11 = vunpack.i.l.bf16 %v4202_v44 }
 0x277   :  { %v1814_v20 = vsel %vm1788_vm2, %v1662_v1, %v4203_v11  ;;  %v1815_v46 = vsel %vm1788_vm2, %v5335_v58, %v4204_v54  ;;  %v1841_v1 = vpack.c.bf16 %v1812_v35, %v1811_v32 }
 0x278   :  { %v1840_v55 = vpack.c.bf16 %v1815_v46, %v1814_v20 }
 0x279   :  { %v1782_v24 = vpop.permute.xlu1 %1781 }
 0x27a   :  { %2088 = vmatprep.mubr.bf16.mxu1 %v1840_v55  ;;  %v1818_v7 = vsel %vm1788_vm2, %v5362_v19, %v1782_v24 }
 0x27b   :  { %2089 = vmatmul.mubr.bf16.gmra.mrb[40].mxu1 %v1839_v39  ;;  %v1844_v58 = vpack.c.bf16 %v1818_v7, %v1818_v7  ;;  %v4348_v39 = vld [vmem:[%s5923_s5 + $0x100] ss:$8 sps:$4 sm:$0xff]  }
 0x27c   :  { %v4207_v48 = vpop.permute.xlu0 %4206  ;;  %v4354_v7 = vld [vmem:[%s5923_s5 + $0x120] ss:$8 sps:$4 sm:$0xff]  }
 0x27d   :  { %v4209_v22 = vunpack.i.h.bf16 %v4207_v48  ;;  %v4208_v0 = vunpack.i.l.bf16 %v4207_v48  ;;  %v4353_v48 = vld [vmem:[%s5923_s5 + $0x114] ss:$8 sps:$4 sm:$0xff]  }
 0x27f   :  { %v1816_v23 = vsel %vm1788_vm2, %v5354_v56, %v4208_v0  ;;  %v1817_v63 = vsel %vm1788_vm2, %v5351_v4, %v4209_v22  ;;  %v4351_v22 = vld [vmem:[%s5923_s5 + $0x110] ss:$8 sps:$4 sm:$0xff]   ;;  %v4356_v0 = vld [vmem:[%s5923_s5 + $0x124] ss:$8 sps:$4 sm:$0xff]  }
 0x280   :  { %v1842_v2 = vpack.c.bf16 %v1817_v63, %v1816_v23  ;;  %v4359_v23 = vld [vmem:[%s5923_s5 + $0x134] ss:$8 sps:$4 sm:$0xff]   ;;  %v4357_v63 = vld [vmem:[%s5923_s5 + $0x130] ss:$8 sps:$4 sm:$0xff]  }
 0x282   :  { %2094 = vmatprep.mubr.bf16.mxu1 %v1842_v2  ;;  %v4362_v2 = vld [vmem:[%s5923_s5 + $0x144] ss:$8 sps:$4 sm:$0xff]  }
 0x283   :  { %2095 = vmatmul.mubr.bf16.gmra.mrb[44].mxu1 %v1841_v1  ;;  %v4360_v1 = vld [vmem:[%s5923_s5 + $0x140] ss:$8 sps:$4 sm:$0xff]  }
 0x284   :  { %2100 = vmatprep.mubr.bf16.mxu1 %v1844_v58  ;;  %v4365_v58 = vld [vmem:[%s5923_s5 + $0x154] ss:$8 sps:$4 sm:$0xff]  }
 0x28b   :  { %2101 = vmatmul.mubr.bf16.gmra.mrb[48].mxu1 %v1843_v28  ;;  %v4396_v28 = vld [vmem:[%s5925_s9] ss:$8 sps:$4 sm:$0xff]  }
 0x291   :  { %v3849_v57 = vpop.f32.mrb[0].mxu1 }
 0x292   :  { %v3850_v29 = vpop.f32.mrb[1].mxu1 }
 0x293   :  { %v3851_v43 = vadd.f32 %v3850_v29, %v3849_v57  ;;  %v3852_v37 = vpop.f32.mrb[2].mxu1  ;;  %v4398_v57 = vld [vmem:[%s5925_s9 + $0x4] ss:$8 sps:$4 sm:$0xff]   ;;  %v4363_v29 = vld [vmem:[%s5923_s5 + $0x150] ss:$8 sps:$4 sm:$0xff]  }
 0x294   :  { %v3853_v60 = vpop.f32.mrb[3].mxu1  ;;  %3007 = vmatprep.subr.bf16.mxu0 %v4398_v57 }
 0x295   :  { %v3854_v19 = vadd.f32 %v3853_v60, %v3852_v37  ;;  %v2015_v25 = vadd.f32 %v3851_v43, %v5527_v52  ;;  %3008 = vmatpush1.bf16.msra.mxu0 %v4396_v28  ;;  %v4368_v43 = vld [vmem:[%s5923_s5 + $0x164] ss:$8 sps:$4 sm:$0xff]   ;;  %v4366_v37 = vld [vmem:[%s5923_s5 + $0x160] ss:$8 sps:$4 sm:$0xff]   ;;  %v4371_v60 = vld [vmem:[%s5923_s5 + $0x174] ss:$8 sps:$4 sm:$0xff]  }
 0x297   :  { %v2107_v17 = vmax.f32 %v2015_v25, 0.0  ;;  %v2018_v50 = vadd.f32 %v3854_v19, %v5527_v52  ;;  %v4420_v19 = vld [vmem:[%s5925_s9 + $0x10] ss:$8 sps:$4 sm:$0xff]   ;;  %v4377_v25 = vld [vmem:[%s5923_s5 + $0x194] ss:$8 sps:$4 sm:$0xff]  }
 0x299   :  { %v3855_v51 = vpop.f32.mrb[4].mxu1  ;;  %v2108_v3 = vmax.f32 %v2018_v50, 0.0  ;;  %v4444_v50 = vld [vmem:[%s5925_s9 + $0x20] ss:$8 sps:$4 sm:$0xff]  }
 0x29a   :  { %v3856_v49 = vpop.f32.mrb[5].mxu1 }
 0x29b   :  { %v3857_v56 = vadd.f32 %v3856_v49, %v3855_v51  ;;  %v3858_v12 = vpop.f32.mrb[6].mxu1  ;;  %v4422_v51 = vld [vmem:[%s5925_s9 + $0x14] ss:$8 sps:$4 sm:$0xff]  }
 0x29c   :  { %v3859_v36 = vpop.f32.mrb[7].mxu1  ;;  %3009 = vmatprep.subr.bf16.mxu0 %v4422_v51 }
 0x29d   :  { %v3860_v4 = vadd.f32 %v3859_v36, %v3858_v12  ;;  %v2023_v32 = vadd.f32 %v3857_v56, %v5527_v52  ;;  %v4369_v56 = vld [vmem:[%s5923_s5 + $0x170] ss:$8 sps:$4 sm:$0xff]   ;;  %v4374_v36 = vld [vmem:[%s5923_s5 + $0x184] ss:$8 sps:$4 sm:$0xff]   ;;  %3010 = vmatpush1.bf16.msra.mxu0 %v4420_v19 }
 0x29f   :  { %v2109_v45 = vmax.f32 %v2023_v32, 0.0  ;;  %v2026_v35 = vadd.f32 %v3860_v4, %v5527_v52 }
 0x2a1   :  { %v2110_v54 = vmax.f32 %v2026_v35, 0.0 }
 0x2b5   :  { %v3861_v53 = vpop.f32.mrb[8].mxu1 }
 0x2b6   :  { %v3862_v47 = vpop.f32.mrb[9].mxu1 }
 0x2b7   :  { %v3864_v41 = vpop.f32.mrb[10].mxu1 }
 0x2b8   :  { %v3865_v5 = vpop.f32.mrb[11].mxu1 }
 0x2b9   :  { %v3866_v8 = vadd.f32 %v3865_v5, %v3864_v41  ;;  %v4372_v5 = vld [vmem:[%s5923_s5 + $0x180] ss:$8 sps:$4 sm:$0xff]  }
 0x2bb   :  { %v2033_v38 = vadd.f32 %v3866_v8, %v5527_v52 }
 0x2bd   :  { %v2111_v62 = vmax.f32 %v2033_v38, 0.0  ;;  %v4375_v38 = vld [vmem:[%s5923_s5 + $0x190] ss:$8 sps:$4 sm:$0xff]  }
 0x2be   :  { %v3867_v14 = vpop.f32.mrb[12].mxu1 }
 0x2bf   :  { %v2123_v30 = vmax.f32 %v2107_v17, %v2111_v62  ;;  %v3868_v27 = vpop.f32.mrb[13].mxu1  ;;  %v4380_v62 = vld [vmem:[%s5923_s5 + $0x1a4] ss:$8 sps:$4 sm:$0xff]  }
 0x2c0   :  { %v3869_v16 = vadd.f32 %v3868_v27, %v3867_v14  ;;  %v3870_v61 = vpop.f32.mrb[14].mxu1  ;;  %v4378_v27 = vld [vmem:[%s5923_s5 + $0x1a0] ss:$8 sps:$4 sm:$0xff]  }
 0x2c1   :  { %v3871_v21 = vpop.f32.mrb[15].mxu1 }
 0x2c2   :  { %v2038_v33 = vadd.f32 %v3869_v16, %v5527_v52  ;;  %v3872_v18 = vadd.f32 %v3871_v21, %v3870_v61  ;;  %v4446_v16 = vld [vmem:[%s5925_s9 + $0x24] ss:$8 sps:$4 sm:$0xff]   ;;  %v4383_v21 = vld [vmem:[%s5923_s5 + $0x1b4] ss:$8 sps:$4 sm:$0xff]  }
 0x2c3   :  { %3011 = vmatprep.subr.bf16.mxu0 %v4446_v16  ;;  %v4414_v16 = vld [vmem:[%s5926_s7 + $0x50] ss:$8 sps:$4 sm:$0xff]  }
 0x2c4   :  { %v2112_v15 = vmax.f32 %v2038_v33, 0.0  ;;  %v2041_v13 = vadd.f32 %v3872_v18, %v5527_v52  ;;  %3012 = vmatpush1.bf16.msra.mxu0 %v4444_v50  ;;  %v4381_v33 = vld [vmem:[%s5923_s5 + $0x1b0] ss:$8 sps:$4 sm:$0xff]   ;;  %v4386_v18 = vld [vmem:[%s5923_s5 + $0x1c4] ss:$8 sps:$4 sm:$0xff]  }
 0x2c5   :  { %v4416_v50 = vld [vmem:[%s5926_s7 + $0x54] ss:$8 sps:$4 sm:$0xff]  }
 0x2c6   :  { %v2124_v10 = vmax.f32 %v2108_v3, %v2112_v15  ;;  %v2113_v59 = vmax.f32 %v2041_v13, 0.0  ;;  %v3873_v9 = vpop.f32.mrb[16].mxu1  ;;  %v4384_v3 = vld [vmem:[%s5923_s5 + $0x1c0] ss:$8 sps:$4 sm:$0xff]   ;;  %v4389_v15 = vld [vmem:[%s5923_s5 + $0x1d4] ss:$8 sps:$4 sm:$0xff]  }
 0x2c7   :  { %v3874_v6 = vpop.f32.mrb[17].mxu1  ;;  %v4387_v13 = vld [vmem:[%s5923_s5 + $0x1d0] ss:$8 sps:$4 sm:$0xff]  }
 0x2c8   :  { %v2131_v40 = vmax.f32 %v2123_v30, %v2124_v10  ;;  %v2125_v31 = vmax.f32 %v2109_v45, %v2113_v59  ;;  %v3875_v26 = vadd.f32 %v3874_v6, %v3873_v9  ;;  %v3876_v34 = vpop.f32.mrb[18].mxu1  ;;  %v4392_v45 = vld [vmem:[%s5923_s5 + $0x1e4] ss:$8 sps:$4 sm:$0xff]   ;;  %v4390_v10 = vld [vmem:[%s5923_s5 + $0x1e0] ss:$8 sps:$4 sm:$0xff]  }
 0x2c9   :  { %v3877_v42 = vpop.f32.mrb[19].mxu1  ;;  %v4395_v59 = vld [vmem:[%s5923_s5 + $0x1f4] ss:$8 sps:$4 sm:$0xff]   ;;  %v4393_v9 = vld [vmem:[%s5923_s5 + $0x1f0] ss:$8 sps:$4 sm:$0xff]  }
 0x2ca   :  { %v2046_v44 = vadd.f32 %v3875_v26, %v5527_v52  ;;  %v2135_v24 = vpack.c.bf16 %v2131_v40, %v2131_v40  ;;  %v4401_v6 = vld [vmem:[%s5926_s7 + $0x4] ss:$8 sps:$4 sm:$0xff]  }
 0x2cc   :  { %v2114_v11 = vmax.f32 %v2046_v44, 0.0 }
 0x2ce   :  { %v2126_v20 = vmax.f32 %v2110_v54, %v2114_v11 }
 0x2d0   :  { %v2132_v46 = vmax.f32 %v2125_v31, %v2126_v20 }
 0x2d2   :  { %v2136_v55 = vpack.c.bf16 %v2132_v46, %v2132_v46 }
 0x2d4   :  { %2567 = vmatprep.mubr.bf16.mxu1 %v2136_v55 }
 0x2d5   :  { %2568 = vmatmul.mubr.bf16.vlgmr.msra.gmra.mrb[52].mxu1 %v2135_v24 }
 0x2d6   :  { %2577 = vmatpush1.bf16.msra.mxu1 %v4348_v39 }
 0x2d7   :  { %2578 = vmatprep.subr.bf16.mxu1 %v4353_v48 }
 0x2da   :  { %2579 = vmatpush1.bf16.msra.mxu1 %v4351_v22 }
 0x2db   :  { %2580 = vmatprep.subr.bf16.mxu1 %v4356_v0 }
 0x2de   :  { %2581 = vmatpush1.bf16.msra.mxu1 %v4354_v7 }
 0x2df   :  { %2582 = vmatprep.subr.bf16.mxu1 %v4359_v23 }
 0x2e2   :  { %2583 = vmatpush1.bf16.msra.mxu1 %v4357_v63 }
 0x2e3   :  { %2584 = vmatprep.subr.bf16.mxu1 %v4362_v2 }
 0x2e6   :  { %2585 = vmatpush1.bf16.msra.mxu1 %v4360_v1 }
 0x2e7   :  { %2586 = vmatprep.subr.bf16.mxu1 %v4365_v58 }
 0x2ea   :  { %2587 = vmatpush1.bf16.msra.mxu1 %v4363_v29 }
 0x2eb   :  { %2588 = vmatprep.subr.bf16.mxu1 %v4368_v43 }
 0x2ee   :  { %v3879_v49 = vpop.f32.mrb[20].mxu1  ;;  %2589 = vmatpush1.bf16.msra.mxu1 %v4366_v37 }
 0x2ef   :  { %v3880_v12 = vpop.f32.mrb[21].mxu1  ;;  %2590 = vmatprep.subr.bf16.mxu1 %v4371_v60 }
 0x2f0   :  { %v3881_v4 = vadd.f32 %v3880_v12, %v3879_v49  ;;  %v3882_v53 = vpop.f32.mrb[22].mxu1 }
 0x2f1   :  { %v3883_v47 = vpop.f32.mrb[23].mxu1 }
 0x2f2   :  { %v3884_v41 = vadd.f32 %v3883_v47, %v3882_v53  ;;  %2591 = vmatpush1.bf16.msra.mxu1 %v4369_v56  ;;  %v2053_v34 = vadd.f32 %v3881_v4, %v5527_v52 }
 0x2f3   :  { %2592 = vmatprep.subr.bf16.mxu1 %v4374_v36 }
 0x2f4   :  { %v2115_v54 = vmax.f32 %v2053_v34, 0.0  ;;  %v2056_v39 = vadd.f32 %v3884_v41, %v5527_v52  ;;  %v4432_v34 = vld [vmem:[%s5926_s7 + $0xa0] ss:$8 sps:$4 sm:$0xff]  }
 0x2f6   :  { %v3885_v8 = vpop.f32.mrb[24].mxu1  ;;  %2593 = vmatpush1.bf16.msra.mxu1 %v4372_v5  ;;  %v2116_v63 = vmax.f32 %v2056_v39, 0.0  ;;  %v4399_v5 = vld [vmem:[%s5926_s7] ss:$8 sps:$4 sm:$0xff]  }
 0x2f7   :  { %v3886_v17 = vpop.f32.mrb[25].mxu1  ;;  %2594 = vmatprep.subr.bf16.mxu1 %v4377_v25  ;;  %v4438_v39 = vld [vmem:[%s5926_s7 + $0xc0] ss:$8 sps:$4 sm:$0xff]  }
 0x2f8   :  { %v3887_v14 = vadd.f32 %v3886_v17, %v3885_v8  ;;  %v3888_v30 = vpop.f32.mrb[26].mxu1  ;;  %v4404_v8 = vld [vmem:[%s5926_s7 + $0x14] ss:$8 sps:$4 sm:$0xff]   ;;  %v4405_v17 = vld [vmem:[%s5926_s7 + $0x20] ss:$8 sps:$4 sm:$0xff]  }
 0x2f9   :  { %v3889_v61 = vpop.f32.mrb[27].mxu1 }
 0x2fa   :  { %v3890_v32 = vadd.f32 %v3889_v61, %v3888_v30  ;;  %2595 = vmatpush1.bf16.msra.mxu1 %v4375_v38  ;;  %v2061_v0 = vadd.f32 %v3887_v14, %v5527_v52  ;;  %v4407_v38 = vld [vmem:[%s5926_s7 + $0x24] ss:$8 sps:$4 sm:$0xff]   ;;  %v4408_v14 = vld [vmem:[%s5926_s7 + $0x30] ss:$8 sps:$4 sm:$0xff]  }
 0x2fb   :  { %2596 = vmatprep.subr.bf16.mxu1 %v4380_v62  ;;  %v4410_v62 = vld [vmem:[%s5926_s7 + $0x34] ss:$8 sps:$4 sm:$0xff]   ;;  %v4413_v30 = vld [vmem:[%s5926_s7 + $0x44] ss:$8 sps:$4 sm:$0xff]  }
 0x2fc   :  { %v2117_v58 = vmax.f32 %v2061_v0, 0.0  ;;  %v2064_v37 = vadd.f32 %v3890_v32, %v5527_v52  ;;  %v4419_v61 = vld [vmem:[%s5926_s7 + $0x64] ss:$8 sps:$4 sm:$0xff]   ;;  %v4425_v32 = vld [vmem:[%s5926_s7 + $0x74] ss:$8 sps:$4 sm:$0xff]  }
 0x2fd   :  { %v4447_v0 = vld [vmem:[%s5926_s7 + $0xe0] ss:$8 sps:$4 sm:$0xff]  }
 0x2fe   :  { %2597 = vmatpush1.bf16.msra.mxu1 %v4378_v27  ;;  %v2118_v36 = vmax.f32 %v2064_v37, 0.0  ;;  %v4411_v27 = vld [vmem:[%s5926_s7 + $0x40] ss:$8 sps:$4 sm:$0xff]   ;;  %v4467_v37 = vld [vmem:[%s5925_s9 + $0x74] ss:$8 sps:$4 sm:$0xff]  }
 0x2ff   :  { %2598 = vmatprep.subr.bf16.mxu1 %v4383_v21  ;;  %v4417_v21 = vld [vmem:[%s5926_s7 + $0x60] ss:$8 sps:$4 sm:$0xff]  }
 0x302   :  { %2599 = vmatpush1.bf16.msra.mxu1 %v4381_v33 }
 0x303   :  { %2600 = vmatprep.subr.bf16.mxu1 %v4386_v18  ;;  %v4423_v18 = vld [vmem:[%s5926_s7 + $0x70] ss:$8 sps:$4 sm:$0xff]  }
 0x306   :  { %2601 = vmatpush1.bf16.msra.mxu1 %v4384_v3 }
 0x307   :  { %2602 = vmatprep.subr.bf16.mxu1 %v4389_v15  ;;  %v4428_v15 = vld [vmem:[%s5926_s7 + $0x84] ss:$8 sps:$4 sm:$0xff]  }
 0x30a   :  { %2603 = vmatpush1.bf16.msra.mxu1 %v4387_v13 }
 0x30b   :  { %2604 = vmatprep.subr.bf16.mxu1 %v4392_v45 }
 0x30e   :  { %2605 = vmatpush1.bf16.msra.mxu1 %v4390_v10  ;;  %v4426_v10 = vld [vmem:[%s5926_s7 + $0x80] ss:$8 sps:$4 sm:$0xff]  }
 0x30f   :  { %2606 = vmatprep.subr.bf16.mxu1 %v4395_v59  ;;  %v4431_v59 = vld [vmem:[%s5926_s7 + $0x94] ss:$8 sps:$4 sm:$0xff]  }
 0x312   :  { %2607 = vmatpush1.bf16.msra.mxu1 %v4393_v9 }
 0x313   :  { %2825 = vmatprep.subr.bf16.mxu1 %v4401_v6  ;;  %v4429_v6 = vld [vmem:[%s5926_s7 + $0x90] ss:$8 sps:$4 sm:$0xff]  }
 0x315   :  { %v3891_v35 = vpop.f32.mrb[28].mxu1 }
 0x316   :  { %v3892_v40 = vpop.f32.mrb[29].mxu1 }
 0x317   :  { %v3894_v31 = vpop.f32.mrb[30].mxu1  ;;  %v4434_v40 = vld [vmem:[%s5926_s7 + $0xa4] ss:$8 sps:$4 sm:$0xff]  }
 0x318   :  { %v3895_v26 = vpop.f32.mrb[31].mxu1 }
 0x319   :  { %v3896_v42 = vadd.f32 %v3895_v26, %v3894_v31 }
 0x31b   :  { %v2071_v44 = vadd.f32 %v3896_v42, %v5527_v52  ;;  %v4437_v42 = vld [vmem:[%s5926_s7 + $0xb4] ss:$8 sps:$4 sm:$0xff]  }
 0x31d   :  { %v2119_v11 = vmax.f32 %v2071_v44, 0.0 }
 0x31e   :  { %v3897_v20 = vpop.f32.mrb[32].mxu1 }
 0x31f   :  { %v2127_v46 = vmax.f32 %v2115_v54, %v2119_v11  ;;  %v3898_v55 = vpop.f32.mrb[33].mxu1  ;;  %v4435_v54 = vld [vmem:[%s5926_s7 + $0xb0] ss:$8 sps:$4 sm:$0xff]  }
 0x320   :  { %v3899_v24 = vadd.f32 %v3898_v55, %v3897_v20  ;;  %v3900_v48 = vpop.f32.mrb[34].mxu1  ;;  %v4440_v20 = vld [vmem:[%s5926_s7 + $0xc4] ss:$8 sps:$4 sm:$0xff]  }
 0x321   :  { %v3901_v22 = vpop.f32.mrb[35].mxu1 }
 0x322   :  { %v2076_v7 = vadd.f32 %v3899_v24, %v5527_v52  ;;  %v3902_v23 = vadd.f32 %v3901_v22, %v3900_v48  ;;  %v4443_v24 = vld [vmem:[%s5926_s7 + $0xd4] ss:$8 sps:$4 sm:$0xff]   ;;  %v4441_v48 = vld [vmem:[%s5926_s7 + $0xd0] ss:$8 sps:$4 sm:$0xff]   ;;  %v4449_v22 = vld [vmem:[%s5926_s7 + $0xe4] ss:$8 sps:$4 sm:$0xff]  }
 0x324   :  { %v2120_v2 = vmax.f32 %v2076_v7, 0.0  ;;  %v2079_v1 = vadd.f32 %v3902_v23, %v5527_v52  ;;  %v4452_v7 = vld [vmem:[%s5926_s7 + $0xf4] ss:$8 sps:$4 sm:$0xff]   ;;  %v4450_v23 = vld [vmem:[%s5926_s7 + $0xf0] ss:$8 sps:$4 sm:$0xff]  }
 0x326   :  { %v2128_v28 = vmax.f32 %v2116_v63, %v2120_v2  ;;  %v2121_v57 = vmax.f32 %v2079_v1, 0.0  ;;  %v3903_v29 = vpop.f32.mrb[36].mxu1  ;;  %v4453_v63 = vld [vmem:[%s5925_s9 + $0x30] ss:$8 sps:$4 sm:$0xff]   ;;  %v4455_v2 = vld [vmem:[%s5925_s9 + $0x34] ss:$8 sps:$4 sm:$0xff]  }
 0x327   :  { %v3904_v43 = vpop.f32.mrb[37].mxu1  ;;  %v4458_v1 = vld [vmem:[%s5925_s9 + $0x44] ss:$8 sps:$4 sm:$0xff]   ;;  %3013 = vmatprep.subr.bf16.mxu0 %v4455_v2  ;;  %v4489_v2 = vld [vmem:[%s5930_s13 + $0x30] sm:$0xff]  }
 0x328   :  { %v2133_v60 = vmax.f32 %v2127_v46, %v2128_v28  ;;  %v2129_v19 = vmax.f32 %v2117_v58, %v2121_v57  ;;  %v3905_v51 = vadd.f32 %v3904_v43, %v3903_v29  ;;  %v3906_v49 = vpop.f32.mrb[38].mxu1  ;;  %3014 = vmatpush1.bf16.msra.mxu0 %v4453_v63  ;;  %v4456_v58 = vld [vmem:[%s5925_s9 + $0x40] ss:$8 sps:$4 sm:$0xff]   ;;  %v4461_v28 = vld [vmem:[%s5925_s9 + $0x54] ss:$8 sps:$4 sm:$0xff]  }
 0x329   :  { %v3907_v56 = vpop.f32.mrb[39].mxu1  ;;  %3015 = vmatprep.subr.bf16.mxu0 %v4458_v1  ;;  %v4459_v57 = vld [vmem:[%s5925_s9 + $0x50] ss:$8 sps:$4 sm:$0xff]   ;;  %v4464_v29 = vld [vmem:[%s5925_s9 + $0x64] ss:$8 sps:$4 sm:$0xff]  }
 0x32a   :  { %v2084_v12 = vadd.f32 %v3905_v51, %v5527_v52  ;;  %v2137_v25 = vpack.c.bf16 %v2133_v60, %v2133_v60  ;;  %v4402_v52 = vld [vmem:[%s5926_s7 + $0x10] ss:$8 sps:$4 sm:$0xff]   ;;  %v4462_v43 = vld [vmem:[%s5925_s9 + $0x60] ss:$8 sps:$4 sm:$0xff]  }
 0x32b   :  { %v4465_v60 = vld [vmem:[%s5925_s9 + $0x70] ss:$8 sps:$4 sm:$0xff]   ;;  %v4468_v49 = vld [vmem:[%s5925_s9 + $0x80] ss:$8 sps:$4 sm:$0xff]  }
 0x32c   :  { %v2122_v4 = vmax.f32 %v2084_v12, 0.0  ;;  %3016 = vmatpush1.bf16.msra.mxu0 %v4456_v58  ;;  %v2888_v51 = vld [vmem:[%s5925_s9 + $0x90] sm:$0x77]  ;;  %v4488_v63 = vld [vmem:[%s5930_s13 + $0x28] sm:$0xff]   ;;  %v2889_v1 = vld [vmem:[%s5931_s10] sm:$0x3] }
 0x32d   :  { %3017 = vmatprep.subr.bf16.mxu0 %v4461_v28  ;;  %v3726_v56 = vcombine.high %v2888_v51, %v2888_v51  ;;  %v3725_v12 = vcombine.low %v2888_v51, %v2888_v51 }
 0x32e   :  { %v2130_v53 = vmax.f32 %v2118_v36, %v2122_v4  ;;  %v2205_v4 = vlaneseq }
 0x32f   :  { %v3002_v36 = vsel %vm3000_vm3, %v3725_v12, 0 }
 0x330   :  { %v2134_v47 = vmax.f32 %v2129_v19, %v2130_v53  ;;  %3018 = vmatpush1.bf16.msra.mxu0 %v4459_v57  ;;  %v4470_v19 = vld [vmem:[%s5925_s9 + $0x84] ss:$8 sps:$4 sm:$0xff]   ;;  %v2206_v53 = vshrl.u32 %v2205_v4, 7 }
 0x331   :  { %3019 = vmatprep.subr.bf16.mxu0 %v4464_v29  ;;  %v4491_v4 = vld [vmem:[%s5932_s15] sm:$0xff]  }
 0x332   :  { %v2138_v41 = vpack.c.bf16 %v2134_v47, %v2134_v47  ;;  %v5793_v47 = vsub.s32 0, %v2206_v53 }
 0x334   :  { %2608 = vmatprep.mubr.bf16.mxu1 %v2138_v41  ;;  %3020 = vmatpush1.bf16.msra.mxu0 %v4462_v43  ;;  %v2203_v41 = vld [vmem:[%s5927_s6] sm:$0x3]  ;;  %v2894_v58 = vrot.slane %v2889_v1, %v5793_v47 }
 0x335   :  { %2609 = vmatmul.mubr.bf16.vlgmr.msra.gmra.mrb[52].mxu1 %v2137_v25  ;;  %3021 = vmatprep.subr.bf16.mxu0 %v4467_v37  ;;  %v2208_v25 = vrot.slane %v2203_v41, %v5793_v47 }
 0x336   :  { %2826 = vmatpush1.bf16.msra.mxu1 %v4399_v5  ;;  %v5798_v5 = vsub.s32 1, %v2206_v53  ;;  %v4492_v53 = vld [vmem:[%s5932_s15 + $0x8] sm:$0xff]  }
 0x337   :  { %2827 = vmatprep.subr.bf16.mxu1 %v4404_v8 }
 0x338   :  { %3022 = vmatpush1.bf16.msra.mxu0 %v4465_v60  ;;  %v2212_v8 = vrot.slane %v2203_v41, %v5798_v5  ;;  %v2898_v28 = vrot.slane %v2889_v1, %v5798_v5 }
 0x339   :  { %3023 = vmatprep.subr.bf16.mxu0 %v4470_v19 }
 0x33a   :  { %2828 = vmatpush1.bf16.msra.mxu1 %v4402_v52 }
 0x33b   :  { %2829 = vmatprep.subr.bf16.mxu1 %v4407_v38 }
 0x33c   :  { %3024 = vmatpush1.bf16.msra.mxu0 %v4468_v49 }
 0x33d   :  { %3727 = vmatprep.subr.msk.bf16.mxu0 %vm3000_vm3, %v3726_v56 }
 0x33e   :  { %2830 = vmatpush1.bf16.msra.mxu1 %v4405_v17 }
 0x33f   :  { %2831 = vmatprep.subr.bf16.mxu1 %v4410_v62 }
 0x340   :  { %3026 = vmatpush1.bf16.msra.mxu0 %v3002_v36  ;;  %v4490_v36 = vld [vmem:[%s5930_s13 + $0x38] sm:$0xff]  }
 0x342   :  { %2832 = vmatpush1.bf16.msra.mxu1 %v4408_v14 }
 0x343   :  { %2833 = vmatprep.subr.bf16.mxu1 %v4413_v30 }
 0x346   :  { %2834 = vmatpush1.bf16.msra.mxu1 %v4411_v27 }
 0x347   :  { %2835 = vmatprep.subr.bf16.mxu1 %v4416_v50 }
 0x34a   :  { %2836 = vmatpush1.bf16.msra.mxu1 %v4414_v16 }
 0x34b   :  { %2837 = vmatprep.subr.bf16.mxu1 %v4419_v61 }
 0x34e   :  { %v3909_v33 = vpop.f32.mrb[40].mxu1  ;;  %2838 = vmatpush1.bf16.msra.mxu1 %v4417_v21  ;;  %v4498_v21 = vmov 0  }
 0x34f   :  { %v3910_v3 = vpop.f32.mrb[41].mxu1  ;;  %2839 = vmatprep.subr.bf16.mxu1 %v4425_v32  ;;  %v4473_v32 = vld [vmem:[%s5928_s11] sm:$0xff]   ;;  %v4474_v33 = vld [vmem:[%s5928_s11 + $0x8] sm:$0xff]  }
 0x350   :  { %v3912_v13 = vpop.f32.mrb[42].mxu1  ;;  %v4476_v3 = vld [vmem:[%s5928_s11 + $0x18] sm:$0xff]  }
 0x351   :  { %v3913_v45 = vpop.f32.mrb[43].mxu1  ;;  %v4478_v13 = vld [vmem:[%s5928_s11 + $0x28] sm:$0xff]  }
 0x352   :  { %2840 = vmatpush1.bf16.msra.mxu1 %v4423_v18  ;;  %v4475_v18 = vld [vmem:[%s5928_s11 + $0x10] sm:$0xff]  }
 0x353   :  { %2841 = vmatprep.subr.bf16.mxu1 %v4428_v15  ;;  %v4477_v15 = vld [vmem:[%s5928_s11 + $0x20] sm:$0xff]   ;;  %v4479_v45 = vld [vmem:[%s5928_s11 + $0x30] sm:$0xff]  }
 0x356   :  { %v3915_v9 = vpop.f32.mrb[44].mxu1  ;;  %2842 = vmatpush1.bf16.msra.mxu1 %v4426_v10  ;;  %v4480_v10 = vld [vmem:[%s5928_s11 + $0x38] sm:$0xff]  }
 0x357   :  { %v3916_v35 = vpop.f32.mrb[45].mxu1  ;;  %2843 = vmatprep.subr.bf16.mxu1 %v4431_v59  ;;  %v2653_v59 = vld [vmem:[%s5929_s8] sm:$0x3] }
 0x358   :  { %v3918_v31 = vpop.f32.mrb[46].mxu1  ;;  %v2658_v9 = vrot.slane %v2653_v59, %v5793_v47  ;;  %v3729_v47 = vld [vmem:[%s5933_s12] ss:$0 sm:$0xff] }
 0x359   :  { %v3919_v26 = vpop.f32.mrb[47].mxu1 }
 0x35a   :  { %2844 = vmatpush1.bf16.msra.mxu1 %v4429_v6  ;;  %v2662_v6 = vrot.slane %v2653_v59, %v5798_v5 }
 0x35b   :  { %2845 = vmatprep.subr.bf16.mxu1 %v4434_v40 }
 0x35e   :  { %v3921_v44 = vpop.f32.mrb[48].mxu1  ;;  %2846 = vmatpush1.bf16.msra.mxu1 %v4432_v34 }
 0x35f   :  { %v3922_v11 = vpop.f32.mrb[49].mxu1  ;;  %2847 = vmatprep.subr.bf16.mxu1 %v4437_v42 }
 0x360   :  { %v3924_v46 = vpop.f32.mrb[50].mxu1 }
 0x361   :  { %v3925_v55 = vpop.f32.mrb[51].mxu1  ;;  %v4481_v46 = vld [vmem:[%s5928_s11 + $0x40] sm:$0xff]  }
 0x362   :  { %2848 = vmatpush1.bf16.msra.mxu1 %v4435_v54  ;;  %v4482_v55 = vld [vmem:[%s5928_s11 + $0x48] ss:$0 sps:$4 sm:$0x77]  }
 0x363   :  { %2849 = vmatprep.subr.bf16.mxu1 %v4440_v20 }
 0x366   :  { %2850 = vmatpush1.bf16.msra.mxu1 %v4438_v39  ;;  %v3139_v39 = vsel %vm3000_vm3, %v4482_v55, 0 }
 0x367   :  { %2851 = vmatprep.subr.bf16.mxu1 %v4443_v24  ;;  %v4499_v24 = vmov 0.0  }
 0x368   :  { %4091 = vmatprep.subr.bf16.mxu0 %v4499_v24 }
 0x36a   :  { %2852 = vmatpush1.bf16.msra.mxu1 %v4441_v48  ;;  %v4483_v48 = vld [vmem:[%s5930_s13] sm:$0xff]  }
 0x36b   :  { %2853 = vmatprep.subr.bf16.mxu1 %v4449_v22  ;;  %v4484_v22 = vld [vmem:[%s5930_s13 + $0x8] sm:$0xff]  }
 0x36e   :  { %2854 = vmatpush1.bf16.msra.mxu1 %v4447_v0  ;;  %v4485_v0 = vld [vmem:[%s5930_s13 + $0x10] sm:$0xff]  }
 0x36f   :  { %2855 = vmatprep.subr.bf16.mxu1 %v4452_v7  ;;  %v4486_v7 = vld [vmem:[%s5930_s13 + $0x18] sm:$0xff]  }
 0x372   :  { %2856 = vmatpush1.bf16.msra.mxu1 %v4450_v23  ;;  %v4487_v23 = vld [vmem:[%s5930_s13 + $0x20] sm:$0xff]  }
 0x373   :  { %3141 = vmatprep.subr.bf16.mxu1 %v4498_v21 }
 0x408   :  { %v2610_v52 = vpop.f32.mrb[52].mxu1 }
 0x409   :  { %v4129_v38 = vadd.f32 %v2610_v52, %v2208_v25  ;;  %v2612_v17 = vpop.f32.mrb[53].mxu1 }
 0x40a   :  { %v4130_v62 = vadd.f32 %v2612_v17, %v2212_v8  ;;  %v2614_v14 = vpop.f32.mrb[54].mxu1  ;;  %v4493_v17 = vld [vmem:[%s5932_s15 + $0x10] sm:$0xff]  }
 0x40b   :  { %v2617_v30 = vmax.f32 %v4129_v38, 0.0  ;;  %v2615_v27 = vpop.f32.mrb[55].mxu1 }
 0x40c   :  { %v2618_v50 = vmax.f32 %v4130_v62, 0.0  ;;  %v4494_v62 = vld [vmem:[%s5932_s15 + $0x18] ss:$0 sps:$4 sm:$0x11]  }
 0x40d   :  { %v2619_v61 = vpack.c.bf16 %v2617_v30, %v2617_v30  ;;  %v3335_v14 = vsel %vm803_vm1, %v4494_v62, 0  ;;  %v3741_v30 = vld [vmem:[%s5935_s14] ss:$0 sm:$0xff] }
 0x40e   :  { %v2620_v16 = vpack.c.bf16 %v2618_v50, %v2618_v50 }
 0x410   :  { %2857 = vmatprep.mubr.bf16.mxu1 %v2620_v16 }
 0x411   :  { %2858 = vmatmul.mubr.bf16.vlgmr.msra.gmra.mrb[56].mxu1 %v2619_v61  ;;  %v4495_v61 = vld [vmem:[%s5934_s17] sm:$0x1f]  }
 0x412   :  { %3142 = vmatpush1.bf16.msra.mxu1 %v4473_v32 }
 0x413   :  { %3143 = vmatprep.subr.bf16.mxu1 %v4498_v21 }
 0x416   :  { %3144 = vmatpush1.bf16.msra.mxu1 %v4474_v33 }
 0x417   :  { %3145 = vmatprep.subr.bf16.mxu1 %v4498_v21 }
 0x41a   :  { %3146 = vmatpush1.bf16.msra.mxu1 %v4475_v18 }
 0x41b   :  { %3147 = vmatprep.subr.bf16.mxu1 %v4498_v21 }
 0x41e   :  { %3148 = vmatpush1.bf16.msra.mxu1 %v4476_v3  ;;  %v3399_v3 = vsel %vm3397_vm6, %v4495_v61, 0 }
 0x41f   :  { %3149 = vmatprep.subr.bf16.mxu1 %v4498_v21 }
 0x422   :  { %3150 = vmatpush1.bf16.msra.mxu1 %v4477_v15  ;;  %v3750_v15 = vld [vmem:[%s5936_s16] ss:$0 sm:$0xff] }
 0x423   :  { %3151 = vmatprep.subr.bf16.mxu1 %v4498_v21 }
 0x426   :  { %3152 = vmatpush1.bf16.msra.mxu1 %v4478_v13 }
 0x427   :  { %3153 = vmatprep.subr.bf16.mxu1 %v4498_v21 }
 0x42a   :  { %3154 = vmatpush1.bf16.msra.mxu1 %v4479_v45 }
 0x42b   :  { %3155 = vmatprep.subr.bf16.mxu1 %v4498_v21 }
 0x42e   :  { %3156 = vmatpush1.bf16.msra.mxu1 %v4480_v10 }
 0x42f   :  { %3157 = vmatprep.subr.bf16.mxu1 %v4498_v21 }
 0x432   :  { %3158 = vmatpush1.bf16.msra.mxu1 %v4481_v46 }
 0x433   :  { %3159 = vmatprep.subr.bf16.mxu1 %v4498_v21 }
 0x436   :  { %3160 = vmatpush1.bf16.msra.mxu1 %v3139_v39 }
 0x437   :  { %4111 = vmatprep.subr.bf16.mxu1 %v4499_v24 }
 0x4e4   :  { %v2859_v35 = vpop.f32.mrb[56].mxu1 }
 0x4e5   :  { %v2860_v40 = vadd.f32 %v2859_v35, %v2658_v9  ;;  %v2861_v31 = vpop.f32.mrb[57].mxu1 }
 0x4e6   :  { %v2862_v26 = vadd.f32 %v2861_v31, %v2662_v6  ;;  %v2863_v34 = vpop.f32.mrb[58].mxu1 }
 0x4e7   :  { %v2866_v42 = vmax.f32 %v2860_v40, 0.0  ;;  %v2864_v44 = vpop.f32.mrb[59].mxu1  ;;  %v3756_v40 = vld [vmem:[%s5937_s18] ss:$0 sm:$0xff] }
 0x4e8   :  { %v2867_v54 = vmax.f32 %v2862_v26, 0.0 }
 0x4e9   :  { %v2868_v20 = vpack.c.bf16 %v2866_v42, %v2866_v42 }
 0x4ea   :  { %v2869_v11 = vpack.c.bf16 %v2867_v54, %v2867_v54 }
 0x4ec   :  { %3728 = vmatprep.mubr.msk.bf16.mxu0 %vm2996_vm4, %v2869_v11 }
 0x4ed   :  { %3040 = vmatmul.mubr.bf16.vlgmr.msra.gmra.mrb[144].mxu0 %v2868_v20 }
 0x4ee   :  { %4092 = vmatpush3.bf16.msra.mxu0 %v4483_v48  ;;  %4107 = vmatprep.mubr.msk.bf16.mxu0 %vm4500_vm5, %v4499_v24 }
 0x4ef   :  { %4093 = vmatprep.subr.bf16.mxu0 %v4499_v24 }
 0x4f2   :  { %4094 = vmatpush3.bf16.msra.mxu0 %v4484_v22 }
 0x4f3   :  { %4095 = vmatprep.subr.bf16.mxu0 %v4499_v24 }
 0x4f6   :  { %4096 = vmatpush3.bf16.msra.mxu0 %v4485_v0 }
 0x4f7   :  { %4097 = vmatprep.subr.bf16.mxu0 %v4499_v24 }
 0x4fa   :  { %4098 = vmatpush3.bf16.msra.mxu0 %v4486_v7 }
 0x4fb   :  { %4099 = vmatprep.subr.bf16.mxu0 %v4499_v24 }
 0x4fe   :  { %4100 = vmatpush3.bf16.msra.mxu0 %v4487_v23 }
 0x4ff   :  { %4101 = vmatprep.subr.bf16.mxu0 %v4499_v24 }
 0x502   :  { %4102 = vmatpush3.bf16.msra.mxu0 %v4488_v63 }
 0x503   :  { %4103 = vmatprep.subr.bf16.mxu0 %v4499_v24 }
 0x506   :  { %4104 = vmatpush3.bf16.msra.mxu0 %v4489_v2 }
 0x507   :  { %4105 = vmatprep.subr.bf16.mxu0 %v4499_v24 }
 0x50a   :  { %4106 = vmatpush3.bf16.msra.mxu0 %v4490_v36 }
 0x5c0   :  { %v3041_v57 = vpop.f32.mrb[144].mxu0 }
 0x5c1   :  { %v3042_v29 = vadd.f32 %v3041_v57, %v2894_v58  ;;  %v3043_v43 = vpop.f32.mrb[145].mxu0 }
 0x5c2   :  { %v3044_v37 = vadd.f32 %v3043_v43, %v2898_v28  ;;  %v3045_v60 = vpop.f32.mrb[146].mxu0 }
 0x5c3   :  { %v3048_v19 = vmax.f32 %v3042_v29, 0.0  ;;  %v3046_v51 = vpop.f32.mrb[147].mxu0 }
 0x5c4   :  { %v3049_v49 = vmax.f32 %v3044_v37, 0.0 }
 0x5c5   :  { %v3050_v12 = vpack.c.bf16 %v3048_v19, %v3048_v19 }
 0x5c6   :  { %v3051_v56 = vpack.c.bf16 %v3049_v49, %v3049_v49 }
 0x5c8   :  { %3740 = vmatprep.mubr.msk.bf16.mxu1 %vm2996_vm4, %v3051_v56 }
 0x5c9   :  { %3174 = vmatmul.mubr.bf16.vlgmr.msra.gmra.mrb[60].mxu1 %v3050_v12 }
 0x5ca   :  { %4119 = vmatprep.mubr.msk.bf16.mxu1 %vm4500_vm5, %v4499_v24  ;;  %4112 = vmatpush3.bf16.msra.mxu1 %v4491_v4 }
 0x5cb   :  { %4113 = vmatprep.subr.bf16.mxu1 %v4499_v24 }
 0x5ce   :  { %4114 = vmatpush3.bf16.msra.mxu1 %v4492_v53 }
 0x5cf   :  { %4115 = vmatprep.subr.bf16.mxu1 %v4499_v24 }
 0x5d2   :  { %4116 = vmatpush3.bf16.msra.mxu1 %v4493_v17 }
 0x5d3   :  { %4117 = vmatprep.subr.bf16.mxu1 %v4499_v24 }
 0x5d6   :  { %4118 = vmatpush3.bf16.msra.mxu1 %v3335_v14 }
 0x5d7   :  { %4123 = vmatprep.subr.bf16.mxu1 %v4499_v24 }
 0x69c   :  { %v3175_v41 = vpop.f32.mrb[60].mxu1 }
 0x69d   :  { %v3176_v5 = vadd.f32 %v3729_v47, %v3175_v41  ;;  %v3177_v25 = vpop.f32.mrb[61].mxu1 }
 0x69e   :  { %v3178_v8 = vpop.f32.mrb[62].mxu1 }
 0x69f   :  { %v3181_v52 = vpack.c.bf16 %v3176_v5, %v3176_v5  ;;  %v3179_v38 = vpop.f32.mrb[63].mxu1 }
 0x6a1   :  { %4108 = vmatmul.mubr.bf16.vlgmr.msra.gmra.mrb[148].mxu0 %v3181_v52 }
 0x774   :  { %v3287_v27 = vpop.f32.mrb[148].mxu0 }
 0x775   :  { %v3288_v50 = vadd.f32 %v3741_v30, %v3287_v27  ;;  %v4109_v16 = vpop.f32.mrb[149].mxu0 }
 0x776   :  { %v3290_v21 = vpop.f32.mrb[150].mxu0 }
 0x777   :  { %v3293_v32 = vmax.f32 %v3288_v50, 0.0  ;;  %v4110_v33 = vpop.f32.mrb[151].mxu0 }
 0x779   :  { %v3294_v18 = vpack.c.bf16 %v3293_v32, %v3293_v32 }
 0x77b   :  { %4120 = vmatmul.mubr.msk.bf16.vlgmr.msra.gmra.mrb[64].mxu1 %vm3330_vm7, %v3294_v18 }
 0x77c   :  { %4124 = vmatpush3.bf16.msra.mxu1 %v3399_v3  ;;  %4125 = vmatprep.mubr.msk.bf16.mxu1 %vm4500_vm5, %v4499_v24 }
 0x84e   :  { %v3371_v13 = vpop.f32.mrb[64].mxu1 }
 0x84f   :  { %v3372_v45 = vadd.f32 %v3750_v15, %v3371_v13  ;;  %v4121_v10 = vpop.f32.mrb[65].mxu1 }
 0x850   :  { %v3374_v59 = vpop.f32.mrb[66].mxu1 }
 0x851   :  { %v3377_v9 = vmax.f32 %v3372_v45, 0.0  ;;  %v4122_v6 = vpop.f32.mrb[67].mxu1 }
 0x853   :  { %v3378_v35 = vpack.c.bf16 %v3377_v9, %v3377_v9 }
 0x855   :  { %4126 = vmatmul.mubr.msk.bf16.vlgmr.msra.gmra.mrb[68].mxu1 %vm3393_vm8, %v3378_v35 }
 0x928   :  { %v3435_v31 = vpop.f32.mrb[68].mxu1 }
 0x929   :  { %v3436_v26 = vadd.f32 %v3756_v40, %v3435_v31  ;;  %v4127_v34 = vpop.f32.mrb[69].mxu1 }
 0x92a   :  { %v3438_v42 = vpop.f32.mrb[70].mxu1 }
 0x92b   :  { %v3441_v44 = vadd.f32 %v3436_v26, %v3176_v5  ;;  %v4128_v54 = vpop.f32.mrb[71].mxu1 }
 0x92d   :  { %3442 = vst [vmem:[%s5938_s19] sm:$0xff] %v3441_v44 }

</bundles_post_ra>
